<compile_context>
chip_gen: v7x
topology: tpu7x:2x2x1
jax: 0.10.0
libtpu: 0.0.40
codegen_flags: <defaults>
</compile_context>

<pallas_src>
import jax
import jax.numpy as jnp
import numpy as np
from jax.experimental import pallas as pl
from jax.experimental.pallas import tpu as pltpu

EPS = 1e-5


# --------------------------------- kernel -----------------------------------
def _encoder_block_kernel(x_ref, a1_ref, a2_ref, g1_ref, b1_ref, g2_ref, b2_ref,
                          avg_ref, pdn_ref, pup_ref, lsh_ref, wse_ref,
                          pe0_ref, pe1_ref, x_out_ref, p_out_ref):
    f32 = jnp.float32
    wc = x_out_ref.shape[1]                       # W * Cout (lane-dense width)

    def conv3x3(x, a_ref):                        # x: (N*H, W*Cin_g) f32
        # One bf16 matmul computes all kw taps for all three kh rows at once.
        y = jnp.dot(x.astype(jnp.bfloat16), a_ref[...],
                    preferred_element_type=f32)   # (N*H, 3*W*Cout)
        y0 = y[:, 0:wc]
        y1 = y[:, wc:2 * wc]
        y2 = y[:, 2 * wc:3 * wc]
        # kh=0 / kh=2 taps come from the row above / below; the 0/1 shift matrices
        # also zero the rows that fall in the H zero-padding halo.
        return (jnp.dot(pdn_ref[...], y0, preferred_element_type=f32)
                + y1
                + jnp.dot(pup_ref[...], y2, preferred_element_type=f32))

    def bn_relu(z, g_ref, b_ref):
        # Per-channel batch stats.  avg_ref averages over the W lane-groups and
        # broadcasts the per-channel value back to every (w, c) lane.
        mean = jnp.mean(jnp.dot(z, avg_ref[...], preferred_element_type=f32),
                        axis=0, keepdims=True)
        d = z - mean
        var = jnp.mean(jnp.dot(d * d, avg_ref[...], preferred_element_type=f32),
                       axis=0, keepdims=True)
        y = d * jax.lax.rsqrt(var + EPS) * g_ref[...] + b_ref[...]
        return jnp.maximum(y, 0.0)

    x = x_ref[...].astype(f32)
    h1 = bn_relu(conv3x3(x, a1_ref), g1_ref, b1_ref)
    h2 = bn_relu(conv3x3(h1, a2_ref), g2_ref, b2_ref)
    x_out_ref[...] = h2                           # single dense 128-lane store

    # 2x2 max-pool: pair-max along W (lane-shift matmul), keep even W groups,
    # then pair-max along H via even/odd row-selection matmuls.  One bulk store.
    mw = jnp.maximum(h2, jnp.dot(h2, lsh_ref[...], preferred_element_type=f32))
    zw = jnp.dot(mw, wse_ref[...], preferred_element_type=f32)
    p = jnp.maximum(jnp.dot(pe0_ref[...], zw, preferred_element_type=f32),
                    jnp.dot(pe1_ref[...], zw, preferred_element_type=f32))
    p_out_ref[...] = p


# -------------------------------- wrapper ------------------------------------
def _banded_conv_weight(w, width):
    """(Cout, Cin_g, 3, 3) torch-layout weight -> (W*Cin_g, 3*W*Cout) banded matrix.

    Column block kh holds the kh-th tap row; within a block, output lane
    w_out*Cout+co receives input lane w_in*Cin+ci with coefficient
    w[co, ci, kh, w_in - w_out + 1] (zero outside the band == W zero padding)."""
    cout, cin = w.shape[0], w.shape[1]
    wsel = np.stack([np.eye(width, k=1, dtype=np.float32),    # kw=0: w_in = w_out-1
                     np.eye(width, k=0, dtype=np.float32),    # kw=1: w_in = w_out
                     np.eye(width, k=-1, dtype=np.float32)])  # kw=2: w_in = w_out+1
    t = jnp.einsum("lab,oikl->aikbo", wsel, w.astype(jnp.float32))
    return t.reshape(width * cin, 3 * width * cout).astype(jnp.bfloat16)


def encoder_block_forward(x_nchw, params):
    """encoder_block.forward: returns (x, p) in NCHW, like the PyTorch module."""
    w1, b1, g1, bt1, w2, b2, g2, bt2 = params
    del b1, b2                       # conv biases cancel exactly in train-mode BN
    N, Cin, H, W = x_nchw.shape
    Cout = w1.shape[0]
    NH, WC, Hh, Wh = N * H, W * Cout, H // 2, W // 2

    # Activations in lane-dense 2D layout (N*H, W*C).
    x2d = jnp.transpose(x_nchw, (0, 2, 3, 1)).reshape(NH, W * Cin).astype(jnp.float32)

    a1 = _banded_conv_weight(w1, W)          # (W*Cin , 3*W*Cout) bf16
    a2 = _banded_conv_weight(w2, W)          # (W*Cout, 3*W*Cout) bf16

    brow = lambda v: jnp.tile(v.astype(jnp.float32), (W,)).reshape(1, WC)
    g1b, bt1b, g2b, bt2b = brow(g1), brow(bt1), brow(g2), brow(bt2)

    # Constant 0/1 (and 1/W) selection / averaging matrices, built once on host.
    avg = np.kron(np.ones((W, W), np.float32), np.eye(Cout, dtype=np.float32)) / W
    pdn = np.eye(NH, k=-1, dtype=np.float32)
    pdn[np.arange(NH) % H == 0] = 0.0        # top-halo rows of each image -> zero
    pup = np.eye(NH, k=1, dtype=np.float32)
    pup[np.arange(NH) % H == H - 1] = 0.0    # bottom-halo rows -> zero
    lsh = np.eye(WC, k=-Cout, dtype=np.float32)        # lane shift by one W group
    wse = np.zeros((WC, Wh * Cout), np.float32)        # keep even W groups
    for j in range(Wh):
        wse[2 * j * Cout:(2 * j + 1) * Cout, j * Cout:(j + 1) * Cout] = np.eye(Cout)
    pe0 = np.zeros((N * Hh, NH), np.float32)           # even rows of each image
    pe1 = np.zeros((N * Hh, NH), np.float32)           # odd rows of each image
    for n in range(N):
        for i in range(Hh):
            pe0[n * Hh + i, n * H + 2 * i] = 1.0
            pe1[n * Hh + i, n * H + 2 * i + 1] = 1.0

    args = (x2d, a1, a2, g1b, bt1b, g2b, bt2b,
            jnp.asarray(avg), jnp.asarray(pdn), jnp.asarray(pup),
            jnp.asarray(lsh), jnp.asarray(wse), jnp.asarray(pe0), jnp.asarray(pe1))

    full = lambda a: pl.BlockSpec(tuple(a.shape), lambda i, _n=a.ndim: (0,) * _n)

    x2_flat, p_flat = pl.pallas_call(
        _encoder_block_kernel,
        out_shape=(jax.ShapeDtypeStruct((NH, WC), jnp.float32),
                   jax.ShapeDtypeStruct((N * Hh, Wh * Cout), jnp.float32)),
        grid=(1,),
        in_specs=[full(a) for a in args],
        out_specs=(pl.BlockSpec((NH, WC), lambda i: (0, 0)),
                   pl.BlockSpec((N * Hh, Wh * Cout), lambda i: (0, 0))),
        compiler_params=pltpu.CompilerParams(
            dimension_semantics=("arbitrary",),
            vmem_limit_bytes=32 * 1024 * 1024),
    )(*args)

    x_out = jnp.transpose(x2_flat.reshape(N, H, W, Cout), (0, 3, 1, 2))
    p_out = jnp.transpose(p_flat.reshape(N, Hh, Wh, Cout), (0, 3, 1, 2))
    return x_out, p_out


# -------------------------- pure-JAX reference -------------------------------
def reference_forward(x_nchw, params):
    w1, b1, g1, bt1, w2, b2, g2, bt2 = params

    def conv(x, w, b):
        y = jax.lax.conv_general_dilated(
            x, w, window_strides=(1, 1), padding="SAME",
            dimension_numbers=("NCHW", "OIHW", "NCHW"))
        return y + b[None, :, None, None]

    def bn_relu(x, g, bt):
        mean = jnp.mean(x, axis=(0, 2, 3), keepdims=True)
        var = jnp.mean((x - mean) ** 2, axis=(0, 2, 3), keepdims=True)
        y = (x - mean) / jnp.sqrt(var + EPS) * g[None, :, None, None] \
            + bt[None, :, None, None]
        return jnp.maximum(y, 0.0)

    x1 = bn_relu(conv(x_nchw, w1, b1), g1, bt1)
    x2 = bn_relu(conv(x1, w2, b2), g2, bt2)
    N, C, H, W = x2.shape
    p = jnp.max(x2.reshape(N, C, H // 2, 2, W // 2, 2), axis=(3, 5))
    return x2, p


if __name__ == "__main__":
    N, Cin, Cout, H, W = 2, 4, 8, 16, 16
    keys = jax.random.split(jax.random.PRNGKey(0), 9)
    x = jax.random.normal(keys[0], (N, Cin, H, W), jnp.float32)
    # Parameter shapes follow the PyTorch module: Conv2d(out,in,3,3)+bias(out,),
    # BatchNorm2d weight/bias (out,). Deterministic synthetic init (no checkpoint).
    w1 = 0.3 * jax.random.normal(keys[1], (Cout, Cin, 3, 3), jnp.float32)
    b1 = 0.1 * jax.random.normal(keys[2], (Cout,), jnp.float32)
    g1 = 1.0 + 0.1 * jax.random.normal(keys[3], (Cout,), jnp.float32)
    bt1 = 0.1 * jax.random.normal(keys[4], (Cout,), jnp.float32)
    w2 = 0.3 * jax.random.normal(keys[5], (Cout, Cout, 3, 3), jnp.float32)
    b2 = 0.1 * jax.random.normal(keys[6], (Cout,), jnp.float32)
    g2 = 1.0 + 0.1 * jax.random.normal(keys[7], (Cout,), jnp.float32)
    bt2 = 0.1 * jax.random.normal(keys[8], (Cout,), jnp.float32)
    params = (w1, b1, g1, bt1, w2, b2, g2, bt2)

    x_out, p_out = jax.block_until_ready(encoder_block_forward(x, params))
    x_ref, p_ref = jax.block_until_ready(reference_forward(x, params))

    assert x_out.shape == (N, Cout, H, W)
    assert p_out.shape == (N, Cout, H // 2, W // 2)
    np.testing.assert_allclose(np.asarray(x_out), np.asarray(x_ref), rtol=5e-2, atol=5e-2)
    np.testing.assert_allclose(np.asarray(p_out), np.asarray(p_ref), rtol=5e-2, atol=5e-2)
    print("KERNEL_OK")
</pallas_src>

<mosaic_0001>
module attributes {stable_mosaic.version = 11 : i64} {
  func.func @_encoder_block_kernel(%arg0: i32, %arg1: memref<32x64xf32, #tpu.memory_space<vmem>>, %arg2: memref<64x384xbf16, #tpu.memory_space<vmem>>, %arg3: memref<128x384xbf16, #tpu.memory_space<vmem>>, %arg4: memref<1x128xf32, #tpu.memory_space<vmem>>, %arg5: memref<1x128xf32, #tpu.memory_space<vmem>>, %arg6: memref<1x128xf32, #tpu.memory_space<vmem>>, %arg7: memref<1x128xf32, #tpu.memory_space<vmem>>, %arg8: memref<128x128xf32, #tpu.memory_space<vmem>>, %arg9: memref<32x32xf32, #tpu.memory_space<vmem>>, %arg10: memref<32x32xf32, #tpu.memory_space<vmem>>, %arg11: memref<128x128xf32, #tpu.memory_space<vmem>>, %arg12: memref<128x64xf32, #tpu.memory_space<vmem>>, %arg13: memref<16x32xf32, #tpu.memory_space<vmem>>, %arg14: memref<16x32xf32, #tpu.memory_space<vmem>>, %arg15: memref<32x128xf32, #tpu.memory_space<vmem>>, %arg16: memref<16x64xf32, #tpu.memory_space<vmem>>) attributes {dimension_semantics = [#tpu.dimension_semantics<arbitrary>], iteration_bounds = array<i64: 1>, scalar_prefetch = 0 : i64, scratch_operands = 0 : i64, tpu.core_type = #tpu.core_type<tc>, window_params = [{pipeline_mode = #tpu.pipeline_mode<synchronous>, transform_indices = @transform_0, window_bounds = array<i64: 32, 64>}, {pipeline_mode = #tpu.pipeline_mode<synchronous>, transform_indices = @transform_1, window_bounds = array<i64: 64, 384>}, {pipeline_mode = #tpu.pipeline_mode<synchronous>, transform_indices = @transform_2, window_bounds = array<i64: 128, 384>}, {pipeline_mode = #tpu.pipeline_mode<synchronous>, transform_indices = @transform_3, window_bounds = array<i64: 1, 128>}, {pipeline_mode = #tpu.pipeline_mode<synchronous>, transform_indices = @transform_4, window_bounds = array<i64: 1, 128>}, {pipeline_mode = #tpu.pipeline_mode<synchronous>, transform_indices = @transform_5, window_bounds = array<i64: 1, 128>}, {pipeline_mode = #tpu.pipeline_mode<synchronous>, transform_indices = @transform_6, window_bounds = array<i64: 1, 128>}, {pipeline_mode = #tpu.pipeline_mode<synchronous>, transform_indices = @transform_7, window_bounds = array<i64: 128, 128>}, {pipeline_mode = #tpu.pipeline_mode<synchronous>, transform_indices = @transform_8, window_bounds = array<i64: 32, 32>}, {pipeline_mode = #tpu.pipeline_mode<synchronous>, transform_indices = @transform_9, window_bounds = array<i64: 32, 32>}, {pipeline_mode = #tpu.pipeline_mode<synchronous>, transform_indices = @transform_10, window_bounds = array<i64: 128, 128>}, {pipeline_mode = #tpu.pipeline_mode<synchronous>, transform_indices = @transform_11, window_bounds = array<i64: 128, 64>}, {pipeline_mode = #tpu.pipeline_mode<synchronous>, transform_indices = @transform_12, window_bounds = array<i64: 16, 32>}, {pipeline_mode = #tpu.pipeline_mode<synchronous>, transform_indices = @transform_13, window_bounds = array<i64: 16, 32>}, {pipeline_mode = #tpu.pipeline_mode<synchronous>, transform_indices = @transform_14, window_bounds = array<i64: 32, 128>}, {pipeline_mode = #tpu.pipeline_mode<synchronous>, transform_indices = @transform_15, window_bounds = array<i64: 16, 64>}]} {
    %c0 = arith.constant 0 : index
    %c0_0 = arith.constant 0 : index
    %0 = vector.load %arg1[%c0, %c0_0] : memref<32x64xf32, #tpu.memory_space<vmem>>, vector<32x64xf32>
    %1 = arith.truncf %0 : vector<32x64xf32> to vector<32x64xbf16>
    %c0_1 = arith.constant 0 : index
    %c0_2 = arith.constant 0 : index
    %2 = vector.load %arg2[%c0_1, %c0_2] : memref<64x384xbf16, #tpu.memory_space<vmem>>, vector<64x384xbf16>
    %cst = arith.constant dense<0.000000e+00> : vector<32x384xf32>
    %3 = tpu.matmul %1, %2, %cst {dimension_numbers = #tpu.dot_dimension_numbers<[1], [0], [0], [1], [0, 0, 1, 1], [], []>} : vector<32x64xbf16>, vector<64x384xbf16>, vector<32x384xf32> -> vector<32x384xf32>
    %4 = vector.extract_strided_slice %3 {offsets = [0, 0], sizes = [32, 128], strides = [1, 1]} : vector<32x384xf32> to vector<32x128xf32>
    %5 = vector.extract_strided_slice %3 {offsets = [0, 128], sizes = [32, 128], strides = [1, 1]} : vector<32x384xf32> to vector<32x128xf32>
    %6 = vector.extract_strided_slice %3 {offsets = [0, 256], sizes = [32, 128], strides = [1, 1]} : vector<32x384xf32> to vector<32x128xf32>
    %c0_3 = arith.constant 0 : index
    %c0_4 = arith.constant 0 : index
    %7 = vector.load %arg9[%c0_3, %c0_4] : memref<32x32xf32, #tpu.memory_space<vmem>>, vector<32x32xf32>
    %cst_5 = arith.constant dense<0.000000e+00> : vector<32x128xf32>
    %8 = tpu.matmul %7, %4, %cst_5 {dimension_numbers = #tpu.dot_dimension_numbers<[1], [0], [0], [1], [0, 0, 1, 1], [], []>} : vector<32x32xf32>, vector<32x128xf32>, vector<32x128xf32> -> vector<32x128xf32>
    %9 = arith.addf %8, %5 : vector<32x128xf32>
    %c0_6 = arith.constant 0 : index
    %c0_7 = arith.constant 0 : index
    %10 = vector.load %arg10[%c0_6, %c0_7] : memref<32x32xf32, #tpu.memory_space<vmem>>, vector<32x32xf32>
    %cst_8 = arith.constant dense<0.000000e+00> : vector<32x128xf32>
    %11 = tpu.matmul %10, %6, %cst_8 {dimension_numbers = #tpu.dot_dimension_numbers<[1], [0], [0], [1], [0, 0, 1, 1], [], []>} : vector<32x32xf32>, vector<32x128xf32>, vector<32x128xf32> -> vector<32x128xf32>
    %12 = arith.addf %9, %11 : vector<32x128xf32>
    %c0_9 = arith.constant 0 : index
    %c0_10 = arith.constant 0 : index
    %13 = vector.load %arg8[%c0_9, %c0_10] : memref<128x128xf32, #tpu.memory_space<vmem>>, vector<128x128xf32>
    %cst_11 = arith.constant dense<0.000000e+00> : vector<32x128xf32>
    %14 = tpu.matmul %12, %13, %cst_11 {dimension_numbers = #tpu.dot_dimension_numbers<[1], [0], [0], [1], [0, 0, 1, 1], [], []>} : vector<32x128xf32>, vector<128x128xf32>, vector<32x128xf32> -> vector<32x128xf32>
    %cst_12 = arith.constant dense<0.000000e+00> : vector<128xf32>
    %15 = vector.multi_reduction <add>, %14, %cst_12 [0] : vector<32x128xf32> to vector<128xf32>
    %16 = vector.shape_cast %15 : vector<128xf32> to vector<1x128xf32>
    %cst_13 = arith.constant 3.200000e+01 : f32
    %17 = vector.broadcast %cst_13 : f32 to vector<1x128xf32>
    %18 = arith.divf %16, %17 : vector<1x128xf32>
    %19 = vector.broadcast %18 : vector<1x128xf32> to vector<32x128xf32>
    %20 = arith.subf %12, %19 : vector<32x128xf32>
    %21 = arith.mulf %20, %20 : vector<32x128xf32>
    %c0_14 = arith.constant 0 : index
    %c0_15 = arith.constant 0 : index
    %22 = vector.load %arg8[%c0_14, %c0_15] : memref<128x128xf32, #tpu.memory_space<vmem>>, vector<128x128xf32>
    %cst_16 = arith.constant dense<0.000000e+00> : vector<32x128xf32>
    %23 = tpu.matmul %21, %22, %cst_16 {dimension_numbers = #tpu.dot_dimension_numbers<[1], [0], [0], [1], [0, 0, 1, 1], [], []>} : vector<32x128xf32>, vector<128x128xf32>, vector<32x128xf32> -> vector<32x128xf32>
    %cst_17 = arith.constant dense<0.000000e+00> : vector<128xf32>
    %24 = vector.multi_reduction <add>, %23, %cst_17 [0] : vector<32x128xf32> to vector<128xf32>
    %25 = vector.shape_cast %24 : vector<128xf32> to vector<1x128xf32>
    %cst_18 = arith.constant 3.200000e+01 : f32
    %26 = vector.broadcast %cst_18 : f32 to vector<1x128xf32>
    %27 = arith.divf %25, %26 : vector<1x128xf32>
    %cst_19 = arith.constant 9.99999974E-6 : f32
    %28 = vector.broadcast %cst_19 : f32 to vector<1x128xf32>
    %29 = arith.addf %27, %28 : vector<1x128xf32>
    %30 = math.rsqrt %29 : vector<1x128xf32>
    %31 = vector.broadcast %30 : vector<1x128xf32> to vector<32x128xf32>
    %32 = arith.mulf %20, %31 : vector<32x128xf32>
    %c0_20 = arith.constant 0 : index
    %c0_21 = arith.constant 0 : index
    %33 = vector.load %arg4[%c0_20, %c0_21] : memref<1x128xf32, #tpu.memory_space<vmem>>, vector<1x128xf32>
    %34 = vector.broadcast %33 : vector<1x128xf32> to vector<32x128xf32>
    %35 = arith.mulf %32, %34 : vector<32x128xf32>
    %c0_22 = arith.constant 0 : index
    %c0_23 = arith.constant 0 : index
    %36 = vector.load %arg5[%c0_22, %c0_23] : memref<1x128xf32, #tpu.memory_space<vmem>>, vector<1x128xf32>
    %37 = vector.broadcast %36 : vector<1x128xf32> to vector<32x128xf32>
    %38 = arith.addf %35, %37 : vector<32x128xf32>
    %cst_24 = arith.constant 0.000000e+00 : f32
    %39 = vector.broadcast %cst_24 : f32 to vector<32x128xf32>
    %40 = arith.maximumf %38, %39 : vector<32x128xf32>
    %41 = arith.truncf %40 : vector<32x128xf32> to vector<32x128xbf16>
    %c0_25 = arith.constant 0 : index
    %c0_26 = arith.constant 0 : index
    %42 = vector.load %arg3[%c0_25, %c0_26] : memref<128x384xbf16, #tpu.memory_space<vmem>>, vector<128x384xbf16>
    %cst_27 = arith.constant dense<0.000000e+00> : vector<32x384xf32>
    %43 = tpu.matmul %41, %42, %cst_27 {dimension_numbers = #tpu.dot_dimension_numbers<[1], [0], [0], [1], [0, 0, 1, 1], [], []>} : vector<32x128xbf16>, vector<128x384xbf16>, vector<32x384xf32> -> vector<32x384xf32>
    %44 = vector.extract_strided_slice %43 {offsets = [0, 0], sizes = [32, 128], strides = [1, 1]} : vector<32x384xf32> to vector<32x128xf32>
    %45 = vector.extract_strided_slice %43 {offsets = [0, 128], sizes = [32, 128], strides = [1, 1]} : vector<32x384xf32> to vector<32x128xf32>
    %46 = vector.extract_strided_slice %43 {offsets = [0, 256], sizes = [32, 128], strides = [1, 1]} : vector<32x384xf32> to vector<32x128xf32>
    %c0_28 = arith.constant 0 : index
    %c0_29 = arith.constant 0 : index
    %47 = vector.load %arg9[%c0_28, %c0_29] : memref<32x32xf32, #tpu.memory_space<vmem>>, vector<32x32xf32>
    %cst_30 = arith.constant dense<0.000000e+00> : vector<32x128xf32>
    %48 = tpu.matmul %47, %44, %cst_30 {dimension_numbers = #tpu.dot_dimension_numbers<[1], [0], [0], [1], [0, 0, 1, 1], [], []>} : vector<32x32xf32>, vector<32x128xf32>, vector<32x128xf32> -> vector<32x128xf32>
    %49 = arith.addf %48, %45 : vector<32x128xf32>
    %c0_31 = arith.constant 0 : index
    %c0_32 = arith.constant 0 : index
    %50 = vector.load %arg10[%c0_31, %c0_32] : memref<32x32xf32, #tpu.memory_space<vmem>>, vector<32x32xf32>
    %cst_33 = arith.constant dense<0.000000e+00> : vector<32x128xf32>
    %51 = tpu.matmul %50, %46, %cst_33 {dimension_numbers = #tpu.dot_dimension_numbers<[1], [0], [0], [1], [0, 0, 1, 1], [], []>} : vector<32x32xf32>, vector<32x128xf32>, vector<32x128xf32> -> vector<32x128xf32>
    %52 = arith.addf %49, %51 : vector<32x128xf32>
    %c0_34 = arith.constant 0 : index
    %c0_35 = arith.constant 0 : index
    %53 = vector.load %arg8[%c0_34, %c0_35] : memref<128x128xf32, #tpu.memory_space<vmem>>, vector<128x128xf32>
    %cst_36 = arith.constant dense<0.000000e+00> : vector<32x128xf32>
    %54 = tpu.matmul %52, %53, %cst_36 {dimension_numbers = #tpu.dot_dimension_numbers<[1], [0], [0], [1], [0, 0, 1, 1], [], []>} : vector<32x128xf32>, vector<128x128xf32>, vector<32x128xf32> -> vector<32x128xf32>
    %cst_37 = arith.constant dense<0.000000e+00> : vector<128xf32>
    %55 = vector.multi_reduction <add>, %54, %cst_37 [0] : vector<32x128xf32> to vector<128xf32>
    %56 = vector.shape_cast %55 : vector<128xf32> to vector<1x128xf32>
    %cst_38 = arith.constant 3.200000e+01 : f32
    %57 = vector.broadcast %cst_38 : f32 to vector<1x128xf32>
    %58 = arith.divf %56, %57 : vector<1x128xf32>
    %59 = vector.broadcast %58 : vector<1x128xf32> to vector<32x128xf32>
    %60 = arith.subf %52, %59 : vector<32x128xf32>
    %61 = arith.mulf %60, %60 : vector<32x128xf32>
    %c0_39 = arith.constant 0 : index
    %c0_40 = arith.constant 0 : index
    %62 = vector.load %arg8[%c0_39, %c0_40] : memref<128x128xf32, #tpu.memory_space<vmem>>, vector<128x128xf32>
    %cst_41 = arith.constant dense<0.000000e+00> : vector<32x128xf32>
    %63 = tpu.matmul %61, %62, %cst_41 {dimension_numbers = #tpu.dot_dimension_numbers<[1], [0], [0], [1], [0, 0, 1, 1], [], []>} : vector<32x128xf32>, vector<128x128xf32>, vector<32x128xf32> -> vector<32x128xf32>
    %cst_42 = arith.constant dense<0.000000e+00> : vector<128xf32>
    %64 = vector.multi_reduction <add>, %63, %cst_42 [0] : vector<32x128xf32> to vector<128xf32>
    %65 = vector.shape_cast %64 : vector<128xf32> to vector<1x128xf32>
    %cst_43 = arith.constant 3.200000e+01 : f32
    %66 = vector.broadcast %cst_43 : f32 to vector<1x128xf32>
    %67 = arith.divf %65, %66 : vector<1x128xf32>
    %cst_44 = arith.constant 9.99999974E-6 : f32
    %68 = vector.broadcast %cst_44 : f32 to vector<1x128xf32>
    %69 = arith.addf %67, %68 : vector<1x128xf32>
    %70 = math.rsqrt %69 : vector<1x128xf32>
    %71 = vector.broadcast %70 : vector<1x128xf32> to vector<32x128xf32>
    %72 = arith.mulf %60, %71 : vector<32x128xf32>
    %c0_45 = arith.constant 0 : index
    %c0_46 = arith.constant 0 : index
    %73 = vector.load %arg6[%c0_45, %c0_46] : memref<1x128xf32, #tpu.memory_space<vmem>>, vector<1x128xf32>
    %74 = vector.broadcast %73 : vector<1x128xf32> to vector<32x128xf32>
    %75 = arith.mulf %72, %74 : vector<32x128xf32>
    %c0_47 = arith.constant 0 : index
    %c0_48 = arith.constant 0 : index
    %76 = vector.load %arg7[%c0_47, %c0_48] : memref<1x128xf32, #tpu.memory_space<vmem>>, vector<1x128xf32>
    %77 = vector.broadcast %76 : vector<1x128xf32> to vector<32x128xf32>
    %78 = arith.addf %75, %77 : vector<32x128xf32>
    %cst_49 = arith.constant 0.000000e+00 : f32
    %79 = vector.broadcast %cst_49 : f32 to vector<32x128xf32>
    %80 = arith.maximumf %78, %79 : vector<32x128xf32>
    %c0_50 = arith.constant 0 : index
    %c0_51 = arith.constant 0 : index
    %81 = vector.load %arg15[%c0_50, %c0_51] : memref<32x128xf32, #tpu.memory_space<vmem>>, vector<32x128xf32>
    tpu.vector_store %arg15[%c0_50, %c0_51], %80 {strides = array<i32>} : memref<32x128xf32, #tpu.memory_space<vmem>>, vector<32x128xf32>,
    %c0_52 = arith.constant 0 : index
    %c0_53 = arith.constant 0 : index
    %82 = vector.load %arg11[%c0_52, %c0_53] : memref<128x128xf32, #tpu.memory_space<vmem>>, vector<128x128xf32>
    %cst_54 = arith.constant dense<0.000000e+00> : vector<32x128xf32>
    %83 = tpu.matmul %80, %82, %cst_54 {dimension_numbers = #tpu.dot_dimension_numbers<[1], [0], [0], [1], [0, 0, 1, 1], [], []>} : vector<32x128xf32>, vector<128x128xf32>, vector<32x128xf32> -> vector<32x128xf32>
    %84 = arith.maximumf %80, %83 : vector<32x128xf32>
    %c0_55 = arith.constant 0 : index
    %c0_56 = arith.constant 0 : index
    %85 = vector.load %arg12[%c0_55, %c0_56] : memref<128x64xf32, #tpu.memory_space<vmem>>, vector<128x64xf32>
    %cst_57 = arith.constant dense<0.000000e+00> : vector<32x64xf32>
    %86 = tpu.matmul %84, %85, %cst_57 {dimension_numbers = #tpu.dot_dimension_numbers<[1], [0], [0], [1], [0, 0, 1, 1], [], []>} : vector<32x128xf32>, vector<128x64xf32>, vector<32x64xf32> -> vector<32x64xf32>
    %c0_58 = arith.constant 0 : index
    %c0_59 = arith.constant 0 : index
    %87 = vector.load %arg13[%c0_58, %c0_59] : memref<16x32xf32, #tpu.memory_space<vmem>>, vector<16x32xf32>
    %cst_60 = arith.constant dense<0.000000e+00> : vector<16x64xf32>
    %88 = tpu.matmul %87, %86, %cst_60 {dimension_numbers = #tpu.dot_dimension_numbers<[1], [0], [0], [1], [0, 0, 1, 1], [], []>} : vector<16x32xf32>, vector<32x64xf32>, vector<16x64xf32> -> vector<16x64xf32>
    %c0_61 = arith.constant 0 : index
    %c0_62 = arith.constant 0 : index
    %89 = vector.load %arg14[%c0_61, %c0_62] : memref<16x32xf32, #tpu.memory_space<vmem>>, vector<16x32xf32>
    %cst_63 = arith.constant dense<0.000000e+00> : vector<16x64xf32>
    %90 = tpu.matmul %89, %86, %cst_63 {dimension_numbers = #tpu.dot_dimension_numbers<[1], [0], [0], [1], [0, 0, 1, 1], [], []>} : vector<16x32xf32>, vector<32x64xf32>, vector<16x64xf32> -> vector<16x64xf32>
    %91 = arith.maximumf %88, %90 : vector<16x64xf32>
    %c0_64 = arith.constant 0 : index
    %c0_65 = arith.constant 0 : index
    %92 = vector.load %arg16[%c0_64, %c0_65] : memref<16x64xf32, #tpu.memory_space<vmem>>, vector<16x64xf32>
    tpu.vector_store %arg16[%c0_64, %c0_65], %91 {strides = array<i32>} : memref<16x64xf32, #tpu.memory_space<vmem>>, vector<16x64xf32>,
    return
  }
  func.func @transform_0(%arg0: i32) -> (i32, i32) {
    %c0_i32 = arith.constant 0 : i32
    %c0_i32_0 = arith.constant 0 : i32
    %c0_i32_1 = arith.constant 0 : i32
    return %c0_i32, %c0_i32_0 : i32, i32
  }
  func.func @transform_1(%arg0: i32) -> (i32, i32) {
    %c0_i32 = arith.constant 0 : i32
    %c0_i32_0 = arith.constant 0 : i32
    %c0_i32_1 = arith.constant 0 : i32
    return %c0_i32, %c0_i32_0 : i32, i32
  }
  func.func @transform_2(%arg0: i32) -> (i32, i32) {
    %c0_i32 = arith.constant 0 : i32
    %c0_i32_0 = arith.constant 0 : i32
    %c0_i32_1 = arith.constant 0 : i32
    return %c0_i32, %c0_i32_0 : i32, i32
  }
  func.func @transform_3(%arg0: i32) -> (i32, i32) {
    %c0_i32 = arith.constant 0 : i32
    %c0_i32_0 = arith.constant 0 : i32
    %c0_i32_1 = arith.constant 0 : i32
    return %c0_i32, %c0_i32_0 : i32, i32
  }
  func.func @transform_4(%arg0: i32) -> (i32, i32) {
    %c0_i32 = arith.constant 0 : i32
    %c0_i32_0 = arith.constant 0 : i32
    %c0_i32_1 = arith.constant 0 : i32
    return %c0_i32, %c0_i32_0 : i32, i32
  }
  func.func @transform_5(%arg0: i32) -> (i32, i32) {
    %c0_i32 = arith.constant 0 : i32
    %c0_i32_0 = arith.constant 0 : i32
    %c0_i32_1 = arith.constant 0 : i32
    return %c0_i32, %c0_i32_0 : i32, i32
  }
  func.func @transform_6(%arg0: i32) -> (i32, i32) {
    %c0_i32 = arith.constant 0 : i32
    %c0_i32_0 = arith.constant 0 : i32
    %c0_i32_1 = arith.constant 0 : i32
    return %c0_i32, %c0_i32_0 : i32, i32
  }
  func.func @transform_7(%arg0: i32) -> (i32, i32) {
    %c0_i32 = arith.constant 0 : i32
    %c0_i32_0 = arith.constant 0 : i32
    %c0_i32_1 = arith.constant 0 : i32
    return %c0_i32, %c0_i32_0 : i32, i32
  }
  func.func @transform_8(%arg0: i32) -> (i32, i32) {
    %c0_i32 = arith.constant 0 : i32
    %c0_i32_0 = arith.constant 0 : i32
    %c0_i32_1 = arith.constant 0 : i32
    return %c0_i32, %c0_i32_0 : i32, i32
  }
  func.func @transform_9(%arg0: i32) -> (i32, i32) {
    %c0_i32 = arith.constant 0 : i32
    %c0_i32_0 = arith.constant 0 : i32
    %c0_i32_1 = arith.constant 0 : i32
    return %c0_i32, %c0_i32_0 : i32, i32
  }
  func.func @transform_10(%arg0: i32) -> (i32, i32) {
    %c0_i32 = arith.constant 0 : i32
    %c0_i32_0 = arith.constant 0 : i32
    %c0_i32_1 = arith.constant 0 : i32
    return %c0_i32, %c0_i32_0 : i32, i32
  }
  func.func @transform_11(%arg0: i32) -> (i32, i32) {
    %c0_i32 = arith.constant 0 : i32
    %c0_i32_0 = arith.constant 0 : i32
    %c0_i32_1 = arith.constant 0 : i32
    return %c0_i32, %c0_i32_0 : i32, i32
  }
  func.func @transform_12(%arg0: i32) -> (i32, i32) {
    %c0_i32 = arith.constant 0 : i32
    %c0_i32_0 = arith.constant 0 : i32
    %c0_i32_1 = arith.constant 0 : i32
    return %c0_i32, %c0_i32_0 : i32, i32
  }
  func.func @transform_13(%arg0: i32) -> (i32, i32) {
    %c0_i32 = arith.constant 0 : i32
    %c0_i32_0 = arith.constant 0 : i32
    %c0_i32_1 = arith.constant 0 : i32
    return %c0_i32, %c0_i32_0 : i32, i32
  }
  func.func @transform_14(%arg0: i32) -> (i32, i32) {
    %c0_i32 = arith.constant 0 : i32
    %c0_i32_0 = arith.constant 0 : i32
    %c0_i32_1 = arith.constant 0 : i32
    return %c0_i32, %c0_i32_0 : i32, i32
  }
  func.func @transform_15(%arg0: i32) -> (i32, i32) {
    %c0_i32 = arith.constant 0 : i32
    %c0_i32_0 = arith.constant 0 : i32
    %c0_i32_1 = arith.constant 0 : i32
    return %c0_i32, %c0_i32_0 : i32, i32
  }
}

</mosaic_0001>

<bundles_post_ra>
// kernel: tpu_custom_call.1
= control target key start
LH: loop header
LB: loop body
LE: loop exit
PB: predicated region body
PF: predicated region fallthrough
CT: control target
= control target key end

     0   :  { %21 = vsyncpa [#allocation3], 0  ;;  %s3649_s0 = inlined_call_operand.hbm [shape: f32[32,64], index: 0, kind: input, shape index: {}]   ;;  %s3650_s1 = inlined_call_operand.hbm [shape: bf16[64,384], index: 1, kind: input, shape index: {}]   ;;  %s3651_s2 = inlined_call_operand.vmem [shape: bf16[128,384], index: 2, kind: input, shape index: {}]   ;;  %s3652_s3 = inlined_call_operand.vmem [shape: f32[1,128], index: 3, kind: input, shape index: {}]   ;;  %s3653_s4 = inlined_call_operand.hbm [shape: f32[1,128], index: 4, kind: input, shape index: {}]   ;;  %s3654_s5 = inlined_call_operand.hbm [shape: f32[1,128], index: 5, kind: input, shape index: {}]   ;;  %s3655_s6 = inlined_call_operand.hbm [shape: f32[1,128], index: 6, kind: input, shape index: {}]   ;;  %s3656_s7 = inlined_call_operand.hbm [shape: f32[128,128], index: 7, kind: input, shape index: {}]   ;;  %s3657_s8 = inlined_call_operand.hbm [shape: f32[32,32], index: 8, kind: input, shape index: {}]   ;;  %s3658_s9 = inlined_call_operand.vmem [shape: f32[32,32], index: 9, kind: input, shape index: {}]   ;;  %s3659_s10 = inlined_call_operand.hbm [shape: f32[128,128], index: 10, kind: input, shape index: {}]   ;;  %s3660_s11 = inlined_call_operand.vmem [shape: f32[128,64], index: 11, kind: input, shape index: {}]   ;;  %s3661_s12 = inlined_call_operand.hbm [shape: f32[16,32], index: 12, kind: input, shape index: {}]   ;;  %s3662_s13 = inlined_call_operand.vmem [shape: f32[16,32], index: 13, kind: input, shape index: {}]   ;;  %s3663_s14 = inlined_call_operand.hbm [shape: f32[32,128], index: 14, kind: output, shape index: {0}]   ;;  %s3664_s15 = inlined_call_operand.hbm [shape: f32[16,64], index: 15, kind: output, shape index: {1}]  }
   0x1   :  { %22 = vsyncpa [#allocation6], 0 }
   0x2   :  { %23 = vsyncpa [#allocation9], 0 }
   0x3   :  { %24 = vsyncpa [#allocation12], 0 }
   0x4   :  { %25 = vsyncpa [#allocation15], 0 }
   0x5   :  { %26 = vsyncpa [#allocation4], 0 }
   0x6   :  { %27 = vsyncpa [#allocation19], 0  ;;  %s3048_s18 = smov [#allocation5]   ;;  %s2792_s22 = scalar_lea.hbm %s3650_s1, 1536 }
   0x7   :  { %s45_s19 = sshll.u32 %s3048_s18, 4  ;;  %p2793_p0 = scmp.ne.s32.totalorder %s3650_s1, %s2792_s22  ;;  %s46_s19 = int_to_ptr.vmem [resolvable:$true] %s45_s19 }
   0x8   :  { %p2796_p1 = scmp.lt.u32.totalorder %s2792_s22, %s3650_s1 }
   0xa   :  { %p2798_p2 = pnand %p2796_p1, %p2793_p0 }
   0xc   :  { %2801 = shalt.err (!%p2798_p2)
}
   0xd   :  { %s2802_s27 = scalar_lea.vmem %s46_s19, 1536  ;;  %p2807_p4 = scmp.lt.s32.totalorder %s46_s19, %s46_s19 }
   0xe   :  { %p2803_p3 = scmp.ne.s32.totalorder %s46_s19, %s2802_s27  ;;  %p2808_p5 = scmp.lt.s32.totalorder %s2802_s27, %s2802_s27 }
  0x10   :  { %p2809_p6 = por %p2808_p5, %p2807_p4 }
  0x12   :  { %p2810_p7 = pnand %p2809_p6, %p2803_p3 }
  0x14   :  { %2813 = shalt.err (!%p2810_p7)
}
  0x15   :  { %s3049_s28 = smov 192   ;;  %s3050_s29 = smov 12  }
  0x16   :  { %51 = dma.hbm_to_vmem [thread:$0]  %s3650_s1, 1536, %s46_s19, [#allocation6], %s3049_s28, %s3049_s28, %s3050_s29  }
  0x17   :  { %s3051_s17 = smov [#allocation8]   ;;  %s2814_s22 = scalar_lea.hbm %s3654_s5, 16 }
  0x18   :  { %s72_s18 = sshll.u32 %s3051_s17, 4  ;;  %p2815_p8 = scmp.ne.s32.totalorder %s3654_s5, %s2814_s22  ;;  %s73_s18 = int_to_ptr.vmem [resolvable:$true] %s72_s18 }
  0x19   :  { %p2818_p9 = scmp.lt.u32.totalorder %s2814_s22, %s3654_s5 }
  0x1b   :  { %p2820_p10 = pnand %p2818_p9, %p2815_p8 }
  0x1d   :  { %2823 = shalt.err (!%p2820_p10)
}
  0x1e   :  { %s2824_s27 = scalar_lea.vmem %s73_s18, 16  ;;  %s2828_s1 = scalar_lea.vmem %s73_s18, 32 }
  0x1f   :  { %p2825_p11 = scmp.ne.s32.totalorder %s73_s18, %s2824_s27  ;;  %p2829_p12 = scmp.lt.s32.totalorder %s73_s18, %s73_s18 }
  0x20   :  { %p2830_p13 = scmp.lt.s32.totalorder %s2828_s1, %s2824_s27 }
  0x22   :  { %p2831_p0 = por %p2830_p13, %p2829_p12 }
  0x24   :  { %p2832_p1 = pnand %p2831_p0, %p2825_p11 }
  0x26   :  { %2835 = shalt.err (!%p2832_p1)
}
  0x27   :  { %75 = dma.hbm_to_vmem [thread:$0]  %s3654_s5, 16, %s73_s18, [#allocation9]  }
  0x28   :  { %s3052_s29 = smov [#allocation11]   ;;  %s3053_s16 = smov [#allocation14]  }
  0x29   :  { %s91_s30 = sshll.u32 %s3052_s29, 4  ;;  %s117_s17 = sshll.u32 %s3053_s16, 4  ;;  %s92_s30 = int_to_ptr.vmem [resolvable:$true] %s91_s30  ;;  %s3168_s17 = int_to_ptr.vmem [resolvable:$true] %s117_s17 }
  0x2a   :  { %s2836_s22 = scalar_lea.hbm %s3656_s7, 2048 }
  0x2b   :  { %p2837_p2 = scmp.ne.s32.totalorder %s3656_s7, %s2836_s22  ;;  %p2840_p3 = scmp.lt.u32.totalorder %s2836_s22, %s3656_s7 }
  0x2d   :  { %p2842_p4 = pnand %p2840_p3, %p2837_p2 }
  0x2f   :  { %2845 = shalt.err (!%p2842_p4)
}
  0x30   :  { %s2846_s5 = scalar_lea.vmem %s92_s30, 2048  ;;  %p2851_p6 = scmp.lt.s32.totalorder %s92_s30, %s92_s30 }
  0x31   :  { %p2847_p5 = scmp.ne.s32.totalorder %s92_s30, %s2846_s5  ;;  %p2852_p7 = scmp.lt.s32.totalorder %s2846_s5, %s2846_s5 }
  0x33   :  { %p2853_p8 = por %p2852_p7, %p2851_p6 }
  0x35   :  { %p2854_p9 = pnand %p2853_p8, %p2847_p5 }
  0x37   :  { %2857 = shalt.err (!%p2854_p9)
}
  0x38   :  { %s3054_s18 = smov 128   ;;  %s3055_s27 = smov 8  }
  0x39   :  { %97 = dma.hbm_to_vmem [thread:$0]  %s3656_s7, 2048, %s92_s30, [#allocation12], %s3054_s18, %s3054_s18, %s3055_s27  }
  0x3a   :  { %s2858_s16 = scalar_lea.hbm %s3659_s10, 2048 }
  0x3b   :  { %p2859_p10 = scmp.ne.s32.totalorder %s3659_s10, %s2858_s16  ;;  %p2862_p11 = scmp.lt.u32.totalorder %s2858_s16, %s3659_s10 }
  0x3d   :  { %p2864_p12 = pnand %p2862_p11, %p2859_p10 }
  0x3f   :  { %2867 = shalt.err (!%p2864_p12)
}
  0x40   :  { %s2868_s24 = scalar_lea.vmem %s3168_s17, 2048  ;;  %p2873_p0 = scmp.lt.s32.totalorder %s3168_s17, %s3168_s17 }
  0x41   :  { %p2869_p13 = scmp.ne.s32.totalorder %s3168_s17, %s2868_s24  ;;  %p2874_p1 = scmp.lt.s32.totalorder %s2868_s24, %s2868_s24 }
  0x43   :  { %p2875_p2 = por %p2874_p1, %p2873_p0 }
  0x45   :  { %p2876_p3 = pnand %p2875_p2, %p2869_p13 }
  0x47   :  { %2879 = shalt.err (!%p2876_p3)
}
  0x48   :  { %123 = dma.hbm_to_vmem [thread:$0]  %s3659_s10, 2048, %s3168_s17, [#allocation15], %s3054_s18, %s3054_s18, %s3055_s27  }
  0x49   :  { %s3056_s25 = smov [#allocation2]   ;;  %s3057_s5 = smov [#allocation7]  }
  0x4a   :  { %s33_s26 = sshll.u32 %s3056_s25, 4  ;;  %s62_s1 = sshll.u32 %s3057_s5, 4  ;;  %s34_s26 = int_to_ptr.vmem [resolvable:$true] %s33_s26  ;;  %s63_s1 = int_to_ptr.vmem [resolvable:$true] %s62_s1 }
  0x4b   :  { %s2880_s29 = scalar_lea.hbm %s3649_s0, 512 }
  0x4c   :  { %p2881_p4 = scmp.ne.s32.totalorder %s3649_s0, %s2880_s29  ;;  %p2884_p5 = scmp.lt.u32.totalorder %s2880_s29, %s3649_s0 }
  0x4e   :  { %p2886_p6 = pnand %p2884_p5, %p2881_p4 }
  0x50   :  { %2889 = shalt.err (!%p2886_p6)
}
  0x51   :  { %s2890_s10 = scalar_lea.vmem %s34_s26, 512  ;;  %p2895_p8 = scmp.lt.s32.totalorder %s34_s26, %s34_s26 }
  0x52   :  { %p2891_p7 = scmp.ne.s32.totalorder %s34_s26, %s2890_s10  ;;  %p2896_p9 = scmp.lt.s32.totalorder %s2890_s10, %s2890_s10 }
  0x54   :  { %p2897_p10 = por %p2896_p9, %p2895_p8 }
  0x56   :  { %p2898_p11 = pnand %p2897_p10, %p2891_p7 }
  0x58   :  { %2901 = shalt.err (!%p2898_p11)
}
  0x59   :  { %39 = dma.hbm_to_vmem [thread:$0]  %s3649_s0, 512, %s34_s26, [#allocation3], %s3054_s18, %s3054_s18, %s3055_s27  }
  0x5a   :  { %s2902_s30 = scalar_lea.hbm %s3653_s4, 16 }
  0x5b   :  { %p2903_p12 = scmp.ne.s32.totalorder %s3653_s4, %s2902_s30  ;;  %p2906_p13 = scmp.lt.u32.totalorder %s2902_s30, %s3653_s4 }
  0x5d   :  { %p2908_p0 = pnand %p2906_p13, %p2903_p12 }
  0x5f   :  { %2911 = shalt.err (!%p2908_p0)
}
  0x60   :  { %s2912_s29 = scalar_lea.vmem %s63_s1, 16  ;;  %s2916_s16 = scalar_lea.vmem %s63_s1, 32 }
  0x61   :  { %p2913_p1 = scmp.ne.s32.totalorder %s63_s1, %s2912_s29  ;;  %p2917_p2 = scmp.lt.s32.totalorder %s63_s1, %s63_s1 }
  0x62   :  { %p2918_p3 = scmp.lt.s32.totalorder %s2916_s16, %s2912_s29 }
  0x64   :  { %p2919_p4 = por %p2918_p3, %p2917_p2 }
  0x66   :  { %p2920_p5 = pnand %p2919_p4, %p2913_p1 }
  0x68   :  { %2923 = shalt.err (!%p2920_p5)
}
  0x69   :  { %65 = dma.hbm_to_vmem [thread:$0]  %s3653_s4, 16, %s63_s1, [#allocation6]  }
  0x6a   :  { %s3058_s20 = smov [#allocation10]   ;;  %s3059_s22 = smov [#allocation13]  }
  0x6b   :  { %s82_s21 = sshll.u32 %s3058_s20, 4  ;;  %s103_s10 = sshll.u32 %s3059_s22, 4  ;;  %s83_s21 = int_to_ptr.vmem [resolvable:$true] %s82_s21  ;;  %s3232_s10 = int_to_ptr.vmem [resolvable:$true] %s103_s10 }
  0x6c   :  { %s2924_s24 = scalar_lea.hbm %s3655_s6, 16 }
  0x6d   :  { %p2925_p6 = scmp.ne.s32.totalorder %s3655_s6, %s2924_s24  ;;  %p2928_p7 = scmp.lt.u32.totalorder %s2924_s24, %s3655_s6 }
  0x6f   :  { %p2930_p8 = pnand %p2928_p7, %p2925_p6 }
  0x71   :  { %2933 = shalt.err (!%p2930_p8)
}
  0x72   :  { %s2934_s4 = scalar_lea.vmem %s83_s21, 16  ;;  %s2938_s1 = scalar_lea.vmem %s83_s21, 32 }
  0x73   :  { %p2935_p9 = scmp.ne.s32.totalorder %s83_s21, %s2934_s4  ;;  %p2939_p10 = scmp.lt.s32.totalorder %s83_s21, %s83_s21 }
  0x74   :  { %p2940_p11 = scmp.lt.s32.totalorder %s2938_s1, %s2934_s4 }
  0x76   :  { %p2941_p12 = por %p2940_p11, %p2939_p10 }
  0x78   :  { %p2942_p13 = pnand %p2941_p12, %p2935_p9 }
  0x7a   :  { %2945 = shalt.err (!%p2942_p13)
}
  0x7b   :  { %85 = dma.hbm_to_vmem [thread:$0]  %s3655_s6, 16, %s83_s21, [#allocation9]  }
  0x7c   :  { %s2946_s0 = scalar_lea.hbm %s3657_s8, 512 }
  0x7d   :  { %p2947_p0 = scmp.ne.s32.totalorder %s3657_s8, %s2946_s0  ;;  %p2950_p1 = scmp.lt.u32.totalorder %s2946_s0, %s3657_s8 }
  0x7f   :  { %p2952_p2 = pnand %p2950_p1, %p2947_p0 }
  0x81   :  { %2955 = shalt.err (!%p2952_p2)
}
  0x82   :  { %s2956_s23 = scalar_lea.vmem %s3232_s10, 512  ;;  %p2961_p4 = scmp.lt.s32.totalorder %s3232_s10, %s3232_s10 }
  0x83   :  { %p2957_p3 = scmp.ne.s32.totalorder %s3232_s10, %s2956_s23  ;;  %p2962_p5 = scmp.lt.s32.totalorder %s2956_s23, %s2956_s23 }
  0x85   :  { %p2963_p6 = por %p2962_p5, %p2961_p4 }
  0x87   :  { %p2964_p7 = pnand %p2963_p6, %p2957_p3 }
  0x89   :  { %2967 = shalt.err (!%p2964_p7)
}
  0x8a   :  { %109 = dma.hbm_to_vmem [thread:$0]  %s3657_s8, 512, %s3232_s10, [#allocation12], %s3054_s18, %s3054_s18, %s3055_s27  }
  0x8b   :  { %s3060_s24 = smov [#allocation16]   ;;  %s2968_s5 = scalar_lea.hbm %s3661_s12, 256 }
  0x8c   :  { %s131_s7 = sshll.u32 %s3060_s24, 4  ;;  %p2969_p8 = scmp.ne.s32.totalorder %s3661_s12, %s2968_s5  ;;  %s132_s7 = int_to_ptr.vmem [resolvable:$true] %s131_s7 }
  0x8d   :  { %p2972_p9 = scmp.lt.u32.totalorder %s2968_s5, %s3661_s12 }
  0x8f   :  { %p2974_p10 = pnand %p2972_p9, %p2969_p8 }
  0x91   :  { %2977 = shalt.err (!%p2974_p10)
}
  0x92   :  { %s2978_s29 = scalar_lea.vmem %s132_s7, 256  ;;  %p2983_p12 = scmp.lt.s32.totalorder %s132_s7, %s132_s7 }
  0x93   :  { %p2979_p11 = scmp.ne.s32.totalorder %s132_s7, %s2978_s29  ;;  %p2984_p13 = scmp.lt.s32.totalorder %s2978_s29, %s2978_s29 }
  0x95   :  { %p2985_p0 = por %p2984_p13, %p2983_p12 }
  0x97   :  { %p2986_p1 = pnand %p2985_p0, %p2979_p11 }
  0x99   :  { %2989 = shalt.err (!%p2986_p1)
}
  0x9a   :  { %137 = dma.hbm_to_vmem [thread:$0]  %s3661_s12, 256, %s132_s7, [#allocation15], %s3054_s18, %s3054_s18, %s3055_s27  }
  0x9b   :  { %3034 = dma.done.wait [#allocation3], 512  }
  0x9c   :  { %3035 = vsyncadd [#allocation3], 4294966784 }
  0x9d   :  { %3036 = dma.done.wait [#allocation6], 1552  }
  0x9e   :  { %3037 = vsyncadd [#allocation6], 4294965744 }
  0x9f   :  { %3038 = dma.done.wait [#allocation9], 32  }
  0xa0   :  { %3039 = vsyncadd [#allocation9], 4294967264 }
  0xa1   :  { %3040 = dma.done.wait [#allocation12], 2560  }
  0xa2   :  { %3041 = vsyncadd [#allocation12], 4294964736 }
  0xa3   :  { %3042 = dma.done.wait [#allocation15], 2304  }
  0xa4   :  { %3043 = vsyncadd [#allocation15], 4294964992  ;;  %v3061_v0 = vmov 0   ;;  %v2740_v1 = vld [vmem:[#allocation5 + $0x4] ss:$12 sps:$4 sm:$0xff]   ;;  %v169_v13 = vld [vmem:[#allocation2 + $0x8] sm:$0xff] }
  0xa5   :  { %293 = vmatprep.mubr.bf16.mxu0 %v3061_v0  ;;  %v2742_v2 = vld [vmem:[#allocation5 + $0x8] ss:$12 sps:$4 sm:$0xff]   ;;  %261 = vmatprep.subr.bf16.mxu0 %v2740_v1  ;;  %v2743_v3 = vld [vmem:[#allocation5] ss:$12 sps:$4 sm:$0xff]   ;;  %v2747_v6 = vld [vmem:[#allocation5 + $0x18] ss:$12 sps:$4 sm:$0xff]  }
  0xa6   :  { %2146 = vmatprep.subr.bf16.mxu1 %v2742_v2  ;;  %v2744_v4 = vld [vmem:[#allocation5 + $0x1c] ss:$12 sps:$4 sm:$0xff]   ;;  %262 = vmatpush1.bf16.msra.mxu0 %v2743_v3  ;;  %v2746_v5 = vld [vmem:[#allocation5 + $0x20] ss:$12 sps:$4 sm:$0xff]   ;;  %v2750_v8 = vld [vmem:[#allocation5 + $0x38] ss:$12 sps:$4 sm:$0xff]  }
  0xa7   :  { %2147 = vmatpush3.bf16.msra.mxu1 %v2742_v2  ;;  %263 = vmatprep.subr.bf16.mxu0 %v2744_v4  ;;  %v2748_v7 = vld [vmem:[#allocation5 + $0x34] ss:$12 sps:$4 sm:$0xff]   ;;  %v2751_v9 = vld [vmem:[#allocation5 + $0x30] ss:$12 sps:$4 sm:$0xff]   ;;  %v2752_v10 = vld [vmem:[#allocation5 + $0x4c] ss:$12 sps:$4 sm:$0xff]  }
  0xa8   :  { %2148 = vmatprep.subr.bf16.mxu1 %v2746_v5  ;;  %v2754_v11 = vld [vmem:[#allocation5 + $0x50] ss:$12 sps:$4 sm:$0xff]   ;;  %v168_v12 = vld [vmem:[#allocation2] sm:$0xff]  ;;  %v2755_v14 = vld [vmem:[#allocation5 + $0x48] ss:$12 sps:$4 sm:$0xff]   ;;  %vm254_vm0 = vcmask 523264  }
  0xa9   :  { %v172_v15 = vpack.c.bf16 %v169_v13, %v168_v12  ;;  %v170_v16 = vld [vmem:[#allocation2 + $0x10] sm:$0xff]  ;;  %v171_v17 = vld [vmem:[#allocation2 + $0x18] sm:$0xff]  ;;  %v3287_v19 = vld [vmem:[#allocation13] sm:$0xff]  ;;  %vm367_vm1 = vcmask 261120   ;;  %s3062_s29 = smov [#allocation17]  }
  0xaa   :  { %264 = vmatpush1.bf16.msra.mxu0 %v2747_v6  ;;  %v173_v18 = vpack.c.bf16 %v171_v17, %v170_v16  ;;  %v3294_v20 = vld [vmem:[%s3658_s9] sm:$0xff]  ;;  %v571_v33 = vld [vmem:[#allocation11 + $0x8] sm:$0xff]  ;;  %v572_v42 = vld [vmem:[#allocation11 + $0x10] sm:$0xff]  ;;  %s1870_s8 = sshll.u32 %s3062_s29, 4  ;;  %s1871_s8 = int_to_ptr.vmem [resolvable:$true] %s1870_s8 }
  0xab   :  { %2149 = vmatpush3.bf16.msra.mxu1 %v2746_v5  ;;  %265 = vmatprep.subr.bf16.mxu0 %v2748_v7  ;;  %v570_v32 = vld [vmem:[#allocation11] sm:$0xff]  ;;  %v3316_v41 = vld [vmem:[%s3658_s9 + $0x10] sm:$0xff]  ;;  %v573_v43 = vld [vmem:[#allocation11 + $0x18] sm:$0xff]  ;;  %s2990_s10 = scalar_lea.vmem %s1871_s8, 512  ;;  %p2995_p3 = scmp.lt.s32.totalorder %s1871_s8, %s1871_s8 }
  0xac   :  { %2150 = vmatprep.subr.bf16.mxu1 %v2750_v8  ;;  %2154 = vmatprep.mubr.msk.bf16.mxu1 %vm254_vm0, %v172_v15  ;;  %v3304_v37 = vpack.c.bf16 %v571_v33, %v570_v32  ;;  %v3311_v40 = vld [vmem:[%s3658_s9 + $0x8] sm:$0xff]  ;;  %v3323_v45 = vld [vmem:[#allocation13 + $0x10] sm:$0xff]  ;;  %v3333_v47 = vpack.c.bf16 %v573_v43, %v572_v42  ;;  %v3341_v50 = vld [vmem:[#allocation13 + $0x18] sm:$0xff]  ;;  %p2991_p2 = scmp.ne.s32.totalorder %s1871_s8, %s2990_s10  ;;  %p2996_p4 = scmp.lt.s32.totalorder %s2990_s10, %s2990_s10 }
  0xad   :  { %v3319_v44 = vld [vmem:[#allocation13 + $0x8] sm:$0xff]  ;;  %v3330_v46 = vld [vmem:[%s3658_s9 + $0x18] sm:$0xff]  ;;  %v574_v48 = vld [vmem:[#allocation11 + $0x20] sm:$0xff] }
  0xae   :  { %266 = vmatpush1.bf16.msra.mxu0 %v2751_v9  ;;  %v575_v49 = vld [vmem:[#allocation11 + $0x28] sm:$0xff]  ;;  %v576_v52 = vld [vmem:[#allocation11 + $0x30] sm:$0xff]  ;;  %v577_v53 = vld [vmem:[#allocation11 + $0x38] sm:$0xff]  ;;  %p2997_p5 = por %p2996_p4, %p2995_p3 }
  0xaf   :  { %2151 = vmatpush3.bf16.msra.mxu1 %v2750_v8  ;;  %267 = vmatprep.subr.bf16.mxu0 %v2752_v10  ;;  %v3346_v51 = vpack.c.bf16 %v575_v49, %v574_v48  ;;  %v3354_v54 = vpack.c.bf16 %v577_v53, %v576_v52  ;;  %v578_v55 = vld [vmem:[#allocation11 + $0x40] sm:$0xff]  ;;  %v579_v56 = vld [vmem:[#allocation11 + $0x48] sm:$0xff]  ;;  %v580_v58 = vld [vmem:[#allocation11 + $0x50] sm:$0xff] }
  0xb0   :  { %2152 = vmatprep.subr.bf16.mxu1 %v2754_v11  ;;  %v3360_v57 = vpack.c.bf16 %v579_v56, %v578_v55  ;;  %v581_v59 = vld [vmem:[#allocation11 + $0x58] sm:$0xff]  ;;  %v582_v61 = vld [vmem:[#allocation11 + $0x60] sm:$0xff]  ;;  %v583_v62 = vld [vmem:[#allocation11 + $0x68] sm:$0xff]  ;;  %p2998_p6 = pnand %p2997_p5, %p2991_p2 }
  0xb1   :  { %v3366_v60 = vpack.c.bf16 %v581_v59, %v580_v58  ;;  %v3372_v63 = vpack.c.bf16 %v583_v62, %v582_v61  ;;  %v584_v1 = vld [vmem:[#allocation11 + $0x70] sm:$0xff]  ;;  %v585_v2 = vld [vmem:[#allocation11 + $0x78] sm:$0xff] }
  0xb2   :  { %268 = vmatpush1.bf16.msra.mxu0 %v2755_v14  ;;  %v3381_v3 = vpack.c.bf16 %v585_v2, %v584_v1  ;;  %v2758_v53 = vld [vmem:[%s3651_s2 + $0x4] ss:$12 sps:$4 sm:$0xff]   ;;  %v2756_v55 = vld [vmem:[%s3651_s2] ss:$12 sps:$4 sm:$0xff]   ;;  %v2759_v56 = vld [vmem:[%s3651_s2 + $0x8] ss:$12 sps:$4 sm:$0xff]  }
  0xb3   :  { %2153 = vmatpush3.bf16.msra.mxu1 %v2754_v11  ;;  %v2762_v58 = vld [vmem:[%s3651_s2 + $0x1c] ss:$12 sps:$4 sm:$0xff]   ;;  %v2760_v59 = vld [vmem:[%s3651_s2 + $0x18] ss:$12 sps:$4 sm:$0xff]   ;;  %v2763_v61 = vld [vmem:[%s3651_s2 + $0x20] ss:$12 sps:$4 sm:$0xff]  }
  0xb4   :  { %v2766_v62 = vld [vmem:[%s3651_s2 + $0x34] ss:$12 sps:$4 sm:$0xff]   ;;  %v2764_v1 = vld [vmem:[%s3651_s2 + $0x30] ss:$12 sps:$4 sm:$0xff]   ;;  %v2767_v2 = vld [vmem:[%s3651_s2 + $0x38] ss:$12 sps:$4 sm:$0xff]  }
  0xb5   :  { %1914 = vmatmul.mubr.msk.bf16.vlgmr.msra.gmra.mrb[0].mxu0 %vm254_vm0, %v172_v15 }
  0xb6   :  { %2155 = vmatmul.mubr.msk.bf16.vlgmr.msra.gmra.mrb[0].mxu1 %vm254_vm0, %v173_v18  ;;  %303 = vmatprep.mubr.bf16.mxu0 %v3061_v0 }
  0xb7   :  { %2166 = vmatprep.mubr.msk.f32.mxu1 %vm367_vm1, %v3287_v19 }
  0xbd   :  { %1915 = vmatmul.mubr.msk.bf16.gmra.mrb[4].mxu0 %vm254_vm0, %v173_v18 }
  0xbe   :  { %2180 = vmatprep.mubr.msk.f32.mxu0 %vm367_vm1, %v3294_v20 }
 0x188   :  { %v295_v21 = vpop.f32.mrb[0].mxu0 }
 0x189   :  { %v2156_v22 = vpop.f32.mrb[0].mxu1  ;;  %v3298_v23 = vpop.f32.mrb[1].mxu0 }
 0x18a   :  { %v348_v24 = vpop.f32.mrb[1].mxu1  ;;  %v299_v25 = vpop.f32.mrb[2].mxu0 }
 0x18b   :  { %v2157_v26 = vpop.f32.mrb[2].mxu1  ;;  %v2484_v27 = vpack.c.bf16 %v299_v25, %v295_v21  ;;  %v3300_v29 = vpop.f32.mrb[3].mxu0 }
 0x18c   :  { %v2496_v28 = vpack.c.bf16 %v2157_v26, %v2156_v22  ;;  %v351_v30 = vpop.f32.mrb[3].mxu1 }
 0x18d   :  { %v2492_v31 = vpack.c.bf16 %v351_v30, %v348_v24  ;;  %2485 = vmatprep.subr.bf16.mxu1 %v2484_v27 }
 0x18e   :  { %2487 = vmatpush3.bf16.msra.mxu1 %v2484_v27 }
 0x18f   :  { %2493 = vmatprep.subr.bf16.mxu0 %v2492_v31 }
 0x190   :  { %2495 = vmatpush3.bf16.msra.mxu0 %v2492_v31  ;;  %v305_v34 = vpop.f32.mrb[4].mxu0 }
 0x191   :  { %2497 = vmatprep.subr.bf16.mxu0 %v2496_v28  ;;  %v3302_v35 = vpop.f32.mrb[5].mxu0 }
 0x192   :  { %v309_v36 = vpop.f32.mrb[6].mxu0 }
 0x193   :  { %v2488_v38 = vpack.c.bf16 %v309_v36, %v305_v34  ;;  %v3306_v39 = vpop.f32.mrb[7].mxu0 }
 0x194   :  { %2499 = vmatpush3.bf16.msra.mxu0 %v2496_v28 }
 0x195   :  { %2533 = vmatprep.subr.bf16.mxu0 %v3304_v37  ;;  %2489 = vmatprep.subr.bf16.mxu1 %v2488_v38 }
 0x196   :  { %2491 = vmatpush3.bf16.msra.mxu1 %v2488_v38 }
 0x197   :  { %2181 = vmatmul.mubr.msk.f32.vlgmr.msra.gmra.mrb[8].mxu0 %vm367_vm1, %v3311_v40  ;;  %2501 = vmatprep.subr.bf16.mxu1 %v3304_v37 }
 0x198   :  { %2183 = vmatprep.mubr.msk.f32.mxu0 %vm367_vm1, %v3316_v41  ;;  %2535 = vmatpush3.bf16.msra.mxu0 %v3304_v37 }
 0x199   :  { %2167 = vmatmul.mubr.msk.f32.vlgmr.msra.gmra.mrb[4].mxu1 %vm367_vm1, %v3319_v44  ;;  %2537 = vmatprep.subr.bf16.mxu0 %v3333_v47 }
 0x19a   :  { %2169 = vmatprep.mubr.msk.f32.mxu1 %vm367_vm1, %v3323_v45  ;;  %2503 = vmatpush3.bf16.msra.mxu1 %v3304_v37 }
 0x19b   :  { %2184 = vmatmul.mubr.msk.f32.gmra.mrb[10].mxu0 %vm367_vm1, %v3330_v46  ;;  %2505 = vmatprep.subr.bf16.mxu1 %v3333_v47 }
 0x19c   :  { %2539 = vmatpush3.bf16.msra.mxu0 %v3333_v47 }
 0x19d   :  { %2170 = vmatmul.mubr.msk.f32.gmra.mrb[6].mxu1 %vm367_vm1, %v3341_v50  ;;  %2541 = vmatprep.subr.bf16.mxu0 %v3346_v51 }
 0x19e   :  { %2507 = vmatpush3.bf16.msra.mxu1 %v3333_v47 }
 0x19f   :  { %2509 = vmatprep.subr.bf16.mxu1 %v3346_v51 }
 0x1a0   :  { %2543 = vmatpush3.bf16.msra.mxu0 %v3346_v51 }
 0x1a1   :  { %2545 = vmatprep.subr.bf16.mxu0 %v3354_v54 }
 0x1a2   :  { %2511 = vmatpush3.bf16.msra.mxu1 %v3346_v51 }
 0x1a3   :  { %2513 = vmatprep.subr.bf16.mxu1 %v3354_v54 }
 0x1a4   :  { %2547 = vmatpush3.bf16.msra.mxu0 %v3354_v54 }
 0x1a5   :  { %2549 = vmatprep.subr.bf16.mxu0 %v3360_v57 }
 0x1a6   :  { %2515 = vmatpush3.bf16.msra.mxu1 %v3354_v54 }
 0x1a7   :  { %2517 = vmatprep.subr.bf16.mxu1 %v3360_v57 }
 0x1a8   :  { %2551 = vmatpush3.bf16.msra.mxu0 %v3360_v57 }
 0x1a9   :  { %2553 = vmatprep.subr.bf16.mxu0 %v3366_v60 }
 0x1aa   :  { %2519 = vmatpush3.bf16.msra.mxu1 %v3360_v57 }
 0x1ab   :  { %2521 = vmatprep.subr.bf16.mxu1 %v3366_v60 }
 0x1ac   :  { %2555 = vmatpush3.bf16.msra.mxu0 %v3366_v60 }
 0x1ad   :  { %2557 = vmatprep.subr.bf16.mxu0 %v3372_v63 }
 0x1ae   :  { %2523 = vmatpush3.bf16.msra.mxu1 %v3366_v60 }
 0x1af   :  { %2525 = vmatprep.subr.bf16.mxu1 %v3372_v63 }
 0x1b0   :  { %2559 = vmatpush3.bf16.msra.mxu0 %v3372_v63 }
 0x1b1   :  { %2561 = vmatprep.subr.bf16.mxu0 %v3381_v3 }
 0x1b2   :  { %2527 = vmatpush3.bf16.msra.mxu1 %v3372_v63 }
 0x1b3   :  { %2529 = vmatprep.subr.bf16.mxu1 %v3381_v3 }
 0x1b4   :  { %2563 = vmatpush3.bf16.msra.mxu0 %v3381_v3 }
 0x1b5   :  { %2262 = vmatprep.subr.bf16.mxu0 %v2759_v56 }
 0x1b6   :  { %2531 = vmatpush3.bf16.msra.mxu1 %v3381_v3 }
 0x1b7   :  { %979 = vmatprep.subr.bf16.mxu1 %v2758_v53 }
 0x26a   :  { %v2182_v4 = vpop.f32.mrb[8].mxu0 }
 0x26b   :  { %v547_v5 = vpop.f32.mrb[9].mxu0 }
 0x26c   :  { %v2168_v6 = vpop.f32.mrb[4].mxu1 }
 0x26d   :  { %v452_v7 = vadd.f32 %v2168_v6, %v3300_v29  ;;  %v446_v8 = vpop.f32.mrb[5].mxu1  ;;  %v2771_v6 = vld [vmem:[%s3651_s2 + $0x50] ss:$12 sps:$4 sm:$0xff]  }
 0x26e   :  { %v2185_v9 = vpop.f32.mrb[10].mxu0  ;;  %v447_v10 = vadd.f32 %v446_v8, %v3298_v23  ;;  %v2775_v8 = vld [vmem:[%s3651_s2 + $0x68] ss:$12 sps:$4 sm:$0xff]  }
 0x26f   :  { %v557_v11 = vpop.f32.mrb[11].mxu0  ;;  %v567_v12 = vadd.f32 %v2182_v4, %v452_v7  ;;  %v2770_v4 = vld [vmem:[%s3651_s2 + $0x4c] ss:$12 sps:$4 sm:$0xff]   ;;  %v2774_v7 = vld [vmem:[%s3651_s2 + $0x64] ss:$12 sps:$4 sm:$0xff]  }
 0x270   :  { %v566_v13 = vadd.f32 %v547_v5, %v447_v10  ;;  %v2171_v14 = vpop.f32.mrb[6].mxu1  ;;  %v2768_v5 = vld [vmem:[%s3651_s2 + $0x48] ss:$12 sps:$4 sm:$0xff]  }
 0x271   :  { %v462_v15 = vadd.f32 %v2171_v14, %v3306_v39  ;;  %v456_v16 = vpop.f32.mrb[7].mxu1  ;;  %v2778_v10 = vld [vmem:[%s3651_s2 + $0x7c] ss:$12 sps:$4 sm:$0xff]   ;;  %v2783_v14 = vld [vmem:[%s3651_s2 + $0x98] ss:$12 sps:$4 sm:$0xff]  }
 0x272   :  { %v457_v17 = vadd.f32 %v456_v16, %v3302_v35  ;;  %2218 = vmatprep.mubr.f32.mxu1 %v566_v13  ;;  %v2786_v16 = vld [vmem:[%s3651_s2 + $0xac] ss:$12 sps:$4 sm:$0xff]  }
 0x273   :  { %v569_v18 = vadd.f32 %v2185_v9, %v462_v15  ;;  %2219 = vmatmul.mubr.f32.vlgmr.msra.gmra.mrb[8].mxu1 %v567_v12  ;;  %v2772_v9 = vld [vmem:[%s3651_s2 + $0x60] ss:$12 sps:$4 sm:$0xff]   ;;  %v2780_v15 = vld [vmem:[%s3651_s2 + $0x90] ss:$12 sps:$4 sm:$0xff]  }
 0x274   :  { %v568_v21 = vadd.f32 %v557_v11, %v457_v17  ;;  %980 = vmatpush1.bf16.msra.mxu1 %v2756_v55  ;;  %v2779_v11 = vld [vmem:[%s3651_s2 + $0x80] ss:$12 sps:$4 sm:$0xff]   ;;  %v2787_v17 = vld [vmem:[%s3651_s2 + $0xb0] ss:$12 sps:$4 sm:$0xff]  }
 0x275   :  { %981 = vmatprep.subr.bf16.mxu1 %v2762_v58 }
 0x276   :  { %2221 = vmatprep.mubr.f32.mxu1 %v568_v21 }
 0x277   :  { %2222 = vmatmul.mubr.f32.gmra.mrb[10].mxu1 %v569_v18 }
 0x278   :  { %1011 = vmatprep.mubr.bf16.mxu1 %v3061_v0  ;;  %982 = vmatpush1.bf16.msra.mxu1 %v2760_v59 }
 0x279   :  { %983 = vmatprep.subr.bf16.mxu1 %v2766_v62 }
 0x27c   :  { %984 = vmatpush1.bf16.msra.mxu1 %v2764_v1 }
 0x27d   :  { %985 = vmatprep.subr.bf16.mxu1 %v2770_v4 }
 0x280   :  { %986 = vmatpush1.bf16.msra.mxu1 %v2768_v5 }
 0x281   :  { %987 = vmatprep.subr.bf16.mxu1 %v2774_v7 }
 0x284   :  { %988 = vmatpush1.bf16.msra.mxu1 %v2772_v9 }
 0x285   :  { %989 = vmatprep.subr.bf16.mxu1 %v2778_v10 }
 0x346   :  { %v2220_v22 = vpop.f32.mrb[8].mxu1 }
 0x347   :  { %v652_v24 = vpop.f32.mrb[9].mxu1 }
 0x348   :  { %v671_v23 = vadd.f32 %v2220_v22, %v652_v24 }
 0x34a   :  { %v2223_v25 = vpop.f32.mrb[10].mxu1 }
 0x34b   :  { %v662_v26 = vpop.f32.mrb[11].mxu1 }
 0x34c   :  { %v672_v27 = vadd.f32 %v671_v23, %v662_v26 }
 0x34e   :  { %v673_v28 = vadd.f32 %v2223_v25, %v672_v27 }
 0x350   :  { %v674_v29 = vrot.slane %v673_v28, 4 }
 0x352   :  { %v675_v30 = vadd.f32 %v674_v29, %v673_v28 }
 0x354   :  { %v676_v31 = vrot.slane %v675_v30, 2 }
 0x356   :  { %v677_v32 = vadd.f32 %v676_v31, %v675_v30 }
 0x358   :  { %v678_v33 = vrot.slane %v677_v32, 1 }
 0x35a   :  { %v679_v34 = vadd.f32 %v678_v33, %v677_v32 }
 0x35c   :  { %v681_v35 = vmul.f32 0.03125, %v679_v34 }
 0x35e   :  { %v3392_v36 = vsub.f32 %v566_v13, %v681_v35  ;;  %v3394_v38 = vsub.f32 %v567_v12, %v681_v35  ;;  %v3396_v39 = vsub.f32 %v568_v21, %v681_v35  ;;  %v3402_v48 = vsub.f32 %v569_v18, %v681_v35  ;;  %v2776_v12 = vld [vmem:[%s3651_s2 + $0x78] ss:$12 sps:$4 sm:$0xff]   ;;  %v2782_v13 = vld [vmem:[%s3651_s2 + $0x94] ss:$12 sps:$4 sm:$0xff]  }
 0x35f   :  { %990 = vmatpush1.bf16.msra.mxu1 %v2776_v12  ;;  %v2784_v18 = vld [vmem:[%s3651_s2 + $0xa8] ss:$12 sps:$4 sm:$0xff]  }
 0x360   :  { %v686_v42 = vmul.f32 %v3392_v36, %v3392_v36  ;;  %v687_v43 = vmul.f32 %v3394_v38, %v3394_v38  ;;  %v688_v49 = vmul.f32 %v3396_v39, %v3396_v39  ;;  %v689_v52 = vmul.f32 %v3402_v48, %v3402_v48  ;;  %991 = vmatprep.subr.bf16.mxu1 %v2782_v13 }
 0x362   :  { %2256 = vmatprep.mubr.f32.mxu0 %v686_v42 }
 0x363   :  { %2257 = vmatmul.mubr.f32.vlgmr.msra.gmra.mrb[12].mxu0 %v687_v43  ;;  %992 = vmatpush1.bf16.msra.mxu1 %v2780_v15  ;;  %v1926_v43 = vld [vmem:[%s3652_s3] ss:$0 sm:$0xff] }
 0x364   :  { %2259 = vmatprep.mubr.f32.mxu0 %v688_v49  ;;  %2263 = vmatpush3.bf16.msra.mxu0 %v2759_v56  ;;  %v1927_v56 = vld [vmem:[#allocation7] ss:$0 sm:$0xff] }
 0x365   :  { %2264 = vmatprep.subr.bf16.mxu0 %v2763_v61  ;;  %993 = vmatprep.subr.bf16.mxu1 %v2786_v16 }
 0x367   :  { %2260 = vmatmul.mubr.f32.gmra.mrb[14].mxu0 %v689_v52  ;;  %994 = vmatpush1.bf16.msra.mxu1 %v2784_v18 }
 0x368   :  { %2265 = vmatpush3.bf16.msra.mxu0 %v2763_v61 }
 0x369   :  { %2266 = vmatprep.subr.bf16.mxu0 %v2767_v2 }
 0x36c   :  { %2267 = vmatpush3.bf16.msra.mxu0 %v2767_v2 }
 0x36d   :  { %2268 = vmatprep.subr.bf16.mxu0 %v2771_v6 }
 0x370   :  { %2269 = vmatpush3.bf16.msra.mxu0 %v2771_v6 }
 0x371   :  { %2270 = vmatprep.subr.bf16.mxu0 %v2775_v8 }
 0x374   :  { %2271 = vmatpush3.bf16.msra.mxu0 %v2775_v8 }
 0x375   :  { %2272 = vmatprep.subr.bf16.mxu0 %v2779_v11 }
 0x378   :  { %2273 = vmatpush3.bf16.msra.mxu0 %v2779_v11 }
 0x379   :  { %2274 = vmatprep.subr.bf16.mxu0 %v2783_v14 }
 0x37c   :  { %2275 = vmatpush3.bf16.msra.mxu0 %v2783_v14 }
 0x37d   :  { %2276 = vmatprep.subr.bf16.mxu0 %v2787_v17 }
 0x380   :  { %2277 = vmatpush3.bf16.msra.mxu0 %v2787_v17 }
 0x436   :  { %v2258_v21 = vpop.f32.mrb[12].mxu0 }
 0x437   :  { %v756_v22 = vpop.f32.mrb[13].mxu0 }
 0x438   :  { %v775_v24 = vadd.f32 %v2258_v21, %v756_v22 }
 0x43a   :  { %v2261_v23 = vpop.f32.mrb[14].mxu0 }
 0x43b   :  { %v766_v25 = vpop.f32.mrb[15].mxu0 }
 0x43c   :  { %v776_v26 = vadd.f32 %v775_v24, %v766_v25 }
 0x43e   :  { %v777_v27 = vadd.f32 %v2261_v23, %v776_v26 }
 0x440   :  { %v778_v28 = vrot.slane %v777_v27, 4 }
 0x442   :  { %v779_v29 = vadd.f32 %v778_v28, %v777_v27 }
 0x444   :  { %v780_v30 = vrot.slane %v779_v29, 2 }
 0x446   :  { %v781_v31 = vadd.f32 %v780_v30, %v779_v29 }
 0x448   :  { %v782_v32 = vrot.slane %v781_v31, 1 }
 0x44a   :  { %v783_v33 = vadd.f32 %v782_v32, %v781_v31 }
 0x44c   :  { %v784_v34 = vmul.f32 0.03125, %v783_v33 }
 0x44e   :  { %v785_v35 = vadd.f32 1e-05, %v784_v34 }
 0x450   :  { %2788 = vrsqrt.f32 %v785_v35 }
 0x45a   :  { %v2789_v42 = vpop.eup %2788 }
 0x45b   :  { %v787_v49 = vmul.f32 %v2789_v42, %v3392_v36  ;;  %v788_v52 = vmul.f32 %v2789_v42, %v3394_v38  ;;  %v789_v53 = vmul.f32 %v2789_v42, %v3396_v39  ;;  %v790_v55 = vmul.f32 %v2789_v42, %v3402_v48 }
 0x45d   :  { %v798_v58 = vmul.f32 %v1926_v43, %v787_v49  ;;  %v799_v59 = vmul.f32 %v1926_v43, %v788_v52  ;;  %v800_v61 = vmul.f32 %v1926_v43, %v789_v53  ;;  %v801_v62 = vmul.f32 %v1926_v43, %v790_v55 }
 0x45f   :  { %v809_v1 = vadd.f32 %v1927_v56, %v798_v58  ;;  %v810_v2 = vadd.f32 %v1927_v56, %v799_v59  ;;  %v811_v4 = vadd.f32 %v1927_v56, %v800_v61  ;;  %v812_v5 = vadd.f32 %v1927_v56, %v801_v62 }
 0x461   :  { %v813_v6 = vmax.f32 %v809_v1, 0.0  ;;  %v814_v7 = vmax.f32 %v810_v2, 0.0  ;;  %v815_v8 = vmax.f32 %v811_v4, 0.0  ;;  %v816_v9 = vmax.f32 %v812_v5, 0.0  ;;  %v1489_v1 = vld [vmem:[#allocation14] sm:$0xff]  ;;  %v1490_v2 = vld [vmem:[#allocation14 + $0x8] sm:$0xff] }
 0x462   :  { %v2644_v4 = vpack.c.bf16 %v1490_v2, %v1489_v1  ;;  %v1491_v5 = vld [vmem:[#allocation14 + $0x10] sm:$0xff]  ;;  %v1960_v2 = vld [vmem:[#allocation8] ss:$0 sm:$0xff] }
 0x463   :  { %v817_v36 = vpack.c.bf16 %v814_v7, %v813_v6  ;;  %v818_v10 = vpack.c.bf16 %v816_v9, %v815_v8  ;;  %v1492_v6 = vld [vmem:[#allocation14 + $0x18] sm:$0xff]  ;;  %v1493_v8 = vld [vmem:[#allocation14 + $0x20] sm:$0xff]  ;;  %v1494_v9 = vld [vmem:[#allocation14 + $0x28] sm:$0xff] }
 0x464   :  { %v2648_v7 = vpack.c.bf16 %v1492_v6, %v1491_v5 }
 0x465   :  { %1012 = vmatmul.mubr.bf16.vlgmr.msra.gmra.mrb[12].mxu1 %v817_v36  ;;  %2278 = vmatprep.mubr.bf16.mxu0 %v817_v36  ;;  %v2652_v36 = vpack.c.bf16 %v1494_v9, %v1493_v8  ;;  %v1961_v8 = vld [vmem:[#allocation10] ss:$0 sm:$0xff] }
 0x466   :  { %2279 = vmatmul.mubr.bf16.vlgmr.msra.gmra.mrb[16].mxu0 %v818_v10  ;;  %1021 = vmatprep.mubr.bf16.mxu1 %v3061_v0 }
 0x467   :  { %2290 = vmatprep.mubr.msk.f32.mxu0 %vm367_vm1, %v3287_v19 }
 0x46d   :  { %1022 = vmatmul.mubr.bf16.gmra.mrb[16].mxu1 %v818_v10  ;;  %v1495_v10 = vld [vmem:[#allocation14 + $0x30] sm:$0xff] }
 0x46e   :  { %2304 = vmatprep.mubr.msk.f32.mxu1 %vm367_vm1, %v3294_v20 }
 0x538   :  { %v1013_v38 = vpop.f32.mrb[12].mxu1 }
 0x539   :  { %v3492_v39 = vpop.f32.mrb[13].mxu1  ;;  %v2280_v48 = vpop.f32.mrb[16].mxu0 }
 0x53a   :  { %v1017_v11 = vpop.f32.mrb[14].mxu1  ;;  %v1066_v12 = vpop.f32.mrb[17].mxu0 }
 0x53b   :  { %v2564_v13 = vpack.c.bf16 %v1017_v11, %v1013_v38  ;;  %v1019_v14 = vpop.f32.mrb[15].mxu1  ;;  %v2281_v15 = vpop.f32.mrb[18].mxu0  ;;  %v1496_v38 = vld [vmem:[#allocation14 + $0x38] sm:$0xff]  ;;  %v1498_v11 = vld [vmem:[#allocation14 + $0x48] sm:$0xff] }
 0x53c   :  { %v2576_v16 = vpack.c.bf16 %v2281_v15, %v2280_v48  ;;  %v1069_v17 = vpop.f32.mrb[19].mxu0  ;;  %v1497_v48 = vld [vmem:[#allocation14 + $0x40] sm:$0xff] }
 0x53d   :  { %v2572_v18 = vpack.c.bf16 %v1069_v17, %v1066_v12  ;;  %2565 = vmatprep.subr.bf16.mxu0 %v2564_v13  ;;  %v1499_v12 = vld [vmem:[#allocation14 + $0x50] sm:$0xff]  ;;  %v1502_v17 = vld [vmem:[#allocation14 + $0x68] sm:$0xff] }
 0x53e   :  { %2567 = vmatpush3.bf16.msra.mxu0 %v2564_v13  ;;  %v2660_v13 = vpack.c.bf16 %v1498_v11, %v1497_v48 }
 0x53f   :  { %2573 = vmatprep.subr.bf16.mxu1 %v2572_v18 }
 0x540   :  { %v1023_v0 = vpop.f32.mrb[16].mxu1  ;;  %2575 = vmatpush3.bf16.msra.mxu1 %v2572_v18 }
 0x541   :  { %v1025_v19 = vpop.f32.mrb[17].mxu1  ;;  %2577 = vmatprep.subr.bf16.mxu1 %v2576_v16 }
 0x542   :  { %v1027_v20 = vpop.f32.mrb[18].mxu1 }
 0x543   :  { %v2568_v21 = vpack.c.bf16 %v1027_v20, %v1023_v0  ;;  %v1029_v22 = vpop.f32.mrb[19].mxu1  ;;  %v1503_v0 = vld [vmem:[#allocation14 + $0x70] sm:$0xff] }
 0x544   :  { %2579 = vmatpush3.bf16.msra.mxu1 %v2576_v16  ;;  %v1501_v16 = vld [vmem:[#allocation14 + $0x60] sm:$0xff] }
 0x545   :  { %2569 = vmatprep.subr.bf16.mxu0 %v2568_v21  ;;  %2613 = vmatprep.subr.bf16.mxu1 %v3304_v37  ;;  %v2668_v18 = vpack.c.bf16 %v1502_v17, %v1501_v16 }
 0x546   :  { %2571 = vmatpush3.bf16.msra.mxu0 %v2568_v21  ;;  %v1594_v21 = vld [vmem:[%s3660_s11] sm:$0xff] }
 0x547   :  { %2305 = vmatmul.mubr.msk.f32.vlgmr.msra.gmra.mrb[20].mxu1 %vm367_vm1, %v3311_v40  ;;  %2581 = vmatprep.subr.bf16.mxu0 %v3304_v37 }
 0x548   :  { %2307 = vmatprep.mubr.msk.f32.mxu1 %vm367_vm1, %v3316_v41  ;;  %2615 = vmatpush3.bf16.msra.mxu1 %v3304_v37 }
 0x549   :  { %2291 = vmatmul.mubr.msk.f32.vlgmr.msra.gmra.mrb[20].mxu0 %vm367_vm1, %v3319_v44  ;;  %2617 = vmatprep.subr.bf16.mxu1 %v3333_v47 }
 0x54a   :  { %2293 = vmatprep.mubr.msk.f32.mxu0 %vm367_vm1, %v3323_v45  ;;  %2583 = vmatpush3.bf16.msra.mxu0 %v3304_v37 }
 0x54b   :  { %2308 = vmatmul.mubr.msk.f32.gmra.mrb[22].mxu1 %vm367_vm1, %v3330_v46  ;;  %2585 = vmatprep.subr.bf16.mxu0 %v3333_v47 }
 0x54c   :  { %2619 = vmatpush3.bf16.msra.mxu1 %v3333_v47 }
 0x54d   :  { %2294 = vmatmul.mubr.msk.f32.gmra.mrb[22].mxu0 %vm367_vm1, %v3341_v50  ;;  %2621 = vmatprep.subr.bf16.mxu1 %v3346_v51 }
 0x54e   :  { %2587 = vmatpush3.bf16.msra.mxu0 %v3333_v47 }
 0x54f   :  { %2589 = vmatprep.subr.bf16.mxu0 %v3346_v51 }
 0x550   :  { %2623 = vmatpush3.bf16.msra.mxu1 %v3346_v51 }
 0x551   :  { %2625 = vmatprep.subr.bf16.mxu1 %v3354_v54 }
 0x552   :  { %2591 = vmatpush3.bf16.msra.mxu0 %v3346_v51 }
 0x553   :  { %2593 = vmatprep.subr.bf16.mxu0 %v3354_v54 }
 0x554   :  { %2627 = vmatpush3.bf16.msra.mxu1 %v3354_v54 }
 0x555   :  { %2629 = vmatprep.subr.bf16.mxu1 %v3360_v57 }
 0x556   :  { %2595 = vmatpush3.bf16.msra.mxu0 %v3354_v54 }
 0x557   :  { %2597 = vmatprep.subr.bf16.mxu0 %v3360_v57 }
 0x558   :  { %2631 = vmatpush3.bf16.msra.mxu1 %v3360_v57 }
 0x559   :  { %2633 = vmatprep.subr.bf16.mxu1 %v3366_v60 }
 0x55a   :  { %2599 = vmatpush3.bf16.msra.mxu0 %v3360_v57 }
 0x55b   :  { %2601 = vmatprep.subr.bf16.mxu0 %v3366_v60 }
 0x55c   :  { %2635 = vmatpush3.bf16.msra.mxu1 %v3366_v60 }
 0x55d   :  { %2637 = vmatprep.subr.bf16.mxu1 %v3372_v63 }
 0x55e   :  { %2603 = vmatpush3.bf16.msra.mxu0 %v3366_v60 }
 0x55f   :  { %2605 = vmatprep.subr.bf16.mxu0 %v3372_v63 }
 0x560   :  { %2639 = vmatpush3.bf16.msra.mxu1 %v3372_v63 }
 0x561   :  { %2641 = vmatprep.subr.bf16.mxu1 %v3381_v3 }
 0x562   :  { %2607 = vmatpush3.bf16.msra.mxu0 %v3372_v63 }
 0x563   :  { %2609 = vmatprep.subr.bf16.mxu0 %v3381_v3 }
 0x564   :  { %2643 = vmatpush3.bf16.msra.mxu1 %v3381_v3 }
 0x566   :  { %2611 = vmatpush3.bf16.msra.mxu0 %v3381_v3 }
 0x567   :  { %2645 = vmatprep.subr.bf16.mxu0 %v2644_v4 }
 0x61a   :  { %v2306_v37 = vpop.f32.mrb[20].mxu1 }
 0x61b   :  { %v1232_v40 = vpop.f32.mrb[21].mxu1 }
 0x61c   :  { %v2292_v41 = vpop.f32.mrb[20].mxu0 }
 0x61d   :  { %v1153_v44 = vadd.f32 %v2292_v41, %v1019_v14  ;;  %v1147_v45 = vpop.f32.mrb[21].mxu0  ;;  %v1500_v14 = vld [vmem:[#allocation14 + $0x58] sm:$0xff] }
 0x61e   :  { %v1148_v46 = vadd.f32 %v1147_v45, %v3492_v39  ;;  %v2309_v47 = vpop.f32.mrb[22].mxu1  ;;  %v2656_v39 = vpack.c.bf16 %v1496_v38, %v1495_v10  ;;  %v2664_v15 = vpack.c.bf16 %v1500_v14, %v1499_v12  ;;  %v1597_v41 = vld [vmem:[%s3660_s11 + $0x18] sm:$0xff]  ;;  %v1598_v45 = vld [vmem:[%s3660_s11 + $0x20] sm:$0xff] }
 0x61f   :  { %v1252_v50 = vadd.f32 %v2306_v37, %v1153_v44  ;;  %v1242_v51 = vpop.f32.mrb[23].mxu1  ;;  %v1596_v37 = vld [vmem:[%s3660_s11 + $0x10] sm:$0xff] }
 0x620   :  { %v1251_v54 = vadd.f32 %v1232_v40, %v1148_v46  ;;  %v2295_v57 = vpop.f32.mrb[22].mxu0  ;;  %v2680_v44 = vpack.c.bf16 %v1597_v41, %v1596_v37  ;;  %v1599_v46 = vld [vmem:[%s3660_s11 + $0x28] sm:$0xff] }
 0x621   :  { %v1163_v60 = vadd.f32 %v2295_v57, %v1029_v22  ;;  %v1157_v63 = vpop.f32.mrb[23].mxu0  ;;  %v1595_v22 = vld [vmem:[%s3660_s11 + $0x8] sm:$0xff]  ;;  %v1602_v57 = vld [vmem:[%s3660_s11 + $0x40] sm:$0xff] }
 0x622   :  { %v1158_v24 = vadd.f32 %v1157_v63, %v1025_v19  ;;  %2342 = vmatprep.mubr.f32.mxu0 %v1251_v54  ;;  %v1504_v19 = vld [vmem:[#allocation14 + $0x78] sm:$0xff]  ;;  %v2676_v40 = vpack.c.bf16 %v1595_v22, %v1594_v21  ;;  %v1695_v37 = vld [vmem:[#allocation16] sm:$0xff] }
 0x623   :  { %v1254_v23 = vadd.f32 %v2309_v47, %v1163_v60  ;;  %2343 = vmatmul.mubr.f32.vlgmr.msra.gmra.mrb[24].mxu0 %v1252_v50  ;;  %v2672_v20 = vpack.c.bf16 %v1504_v19, %v1503_v0  ;;  %v2684_v47 = vpack.c.bf16 %v1599_v46, %v1598_v45  ;;  %v1603_v60 = vld [vmem:[%s3660_s11 + $0x48] sm:$0xff] }
 0x624   :  { %v1253_v25 = vadd.f32 %v1242_v51, %v1158_v24  ;;  %2647 = vmatpush3.bf16.msra.mxu0 %v2644_v4  ;;  %2677 = vmatprep.subr.bf16.mxu1 %v2676_v40  ;;  %v1601_v51 = vld [vmem:[%s3660_s11 + $0x38] sm:$0xff]  ;;  %v2692_v63 = vpack.c.bf16 %v1603_v60, %v1602_v57  ;;  %v1604_v24 = vld [vmem:[%s3660_s11 + $0x50] sm:$0xff] }
 0x625   :  { %2649 = vmatprep.subr.bf16.mxu0 %v2648_v7 }
 0x626   :  { %2345 = vmatprep.mubr.f32.mxu0 %v1253_v25 }
 0x627   :  { %2346 = vmatmul.mubr.f32.gmra.mrb[26].mxu0 %v1254_v23 }
 0x628   :  { %2651 = vmatpush3.bf16.msra.mxu0 %v2648_v7 }
 0x629   :  { %2653 = vmatprep.subr.bf16.mxu0 %v2652_v36 }
 0x62c   :  { %2655 = vmatpush3.bf16.msra.mxu0 %v2652_v36 }
 0x62d   :  { %2657 = vmatprep.subr.bf16.mxu0 %v2656_v39 }
 0x630   :  { %2659 = vmatpush3.bf16.msra.mxu0 %v2656_v39 }
 0x631   :  { %2661 = vmatprep.subr.bf16.mxu0 %v2660_v13 }
 0x634   :  { %2663 = vmatpush3.bf16.msra.mxu0 %v2660_v13 }
 0x635   :  { %2665 = vmatprep.subr.bf16.mxu0 %v2664_v15 }
 0x638   :  { %2667 = vmatpush3.bf16.msra.mxu0 %v2664_v15 }
 0x639   :  { %2669 = vmatprep.subr.bf16.mxu0 %v2668_v18 }
 0x63c   :  { %2671 = vmatpush3.bf16.msra.mxu0 %v2668_v18 }
 0x63d   :  { %2673 = vmatprep.subr.bf16.mxu0 %v2672_v20 }
 0x640   :  { %2675 = vmatpush3.bf16.msra.mxu0 %v2672_v20 }
 0x6f6   :  { %v2344_v3 = vpop.f32.mrb[24].mxu0 }
 0x6f7   :  { %v1321_v26 = vpop.f32.mrb[25].mxu0 }
 0x6f8   :  { %v1340_v27 = vadd.f32 %v2344_v3, %v1321_v26  ;;  %v1606_v3 = vld [vmem:[%s3660_s11 + $0x60] sm:$0xff]  ;;  %v1607_v26 = vld [vmem:[%s3660_s11 + $0x68] sm:$0xff] }
 0x6fa   :  { %v2347_v28 = vpop.f32.mrb[26].mxu0 }
 0x6fb   :  { %v1331_v29 = vpop.f32.mrb[27].mxu0 }
 0x6fc   :  { %v1341_v30 = vadd.f32 %v1340_v27, %v1331_v29  ;;  %v2700_v27 = vpack.c.bf16 %v1607_v26, %v1606_v3 }
 0x6fe   :  { %v1342_v31 = vadd.f32 %v2347_v28, %v1341_v30 }
 0x700   :  { %v1343_v32 = vrot.slane %v1342_v31, 4 }
 0x702   :  { %v1344_v33 = vadd.f32 %v1343_v32, %v1342_v31 }
 0x704   :  { %v1345_v34 = vrot.slane %v1344_v33, 2 }
 0x706   :  { %v1346_v35 = vadd.f32 %v1345_v34, %v1344_v33 }
 0x708   :  { %v1347_v42 = vrot.slane %v1346_v35, 1 }
 0x70a   :  { %v1348_v43 = vadd.f32 %v1347_v42, %v1346_v35 }
 0x70c   :  { %v1349_v49 = vmul.f32 0.03125, %v1348_v43 }
 0x70e   :  { %v3539_v52 = vsub.f32 %v1251_v54, %v1349_v49  ;;  %v3541_v53 = vsub.f32 %v1252_v50, %v1349_v49  ;;  %v3543_v55 = vsub.f32 %v1253_v25, %v1349_v49  ;;  %v3549_v59 = vsub.f32 %v1254_v23, %v1349_v49  ;;  %v1600_v50 = vld [vmem:[%s3660_s11 + $0x30] sm:$0xff]  ;;  %v1605_v23 = vld [vmem:[%s3660_s11 + $0x58] sm:$0xff] }
 0x70f   :  { %v2688_v54 = vpack.c.bf16 %v1601_v51, %v1600_v50  ;;  %v2696_v25 = vpack.c.bf16 %v1605_v23, %v1604_v24  ;;  %v1696_v51 = vld [vmem:[#allocation16 + $0x8] sm:$0xff] }
 0x710   :  { %v1354_v56 = vmul.f32 %v3539_v52, %v3539_v52  ;;  %v1355_v58 = vmul.f32 %v3541_v53, %v3541_v53  ;;  %v1356_v61 = vmul.f32 %v3543_v55, %v3543_v55  ;;  %v1357_v62 = vmul.f32 %v3549_v59, %v3549_v59 }
 0x712   :  { %2380 = vmatprep.mubr.f32.mxu1 %v1354_v56 }
 0x713   :  { %2381 = vmatmul.mubr.f32.vlgmr.msra.gmra.mrb[24].mxu1 %v1355_v58 }
 0x714   :  { %2383 = vmatprep.mubr.f32.mxu1 %v1356_v61  ;;  %2679 = vmatpush3.bf16.msra.mxu1 %v2676_v40  ;;  %v1778_v40 = vld [vmem:[%s3662_s13] sm:$0xff] }
 0x715   :  { %2681 = vmatprep.subr.bf16.mxu1 %v2680_v44 }
 0x717   :  { %2384 = vmatmul.mubr.f32.gmra.mrb[26].mxu1 %v1357_v62 }
 0x718   :  { %2683 = vmatpush3.bf16.msra.mxu1 %v2680_v44 }
 0x719   :  { %2685 = vmatprep.subr.bf16.mxu1 %v2684_v47 }
 0x71c   :  { %2687 = vmatpush3.bf16.msra.mxu1 %v2684_v47 }
 0x71d   :  { %2689 = vmatprep.subr.bf16.mxu1 %v2688_v54 }
 0x720   :  { %2691 = vmatpush3.bf16.msra.mxu1 %v2688_v54  ;;  %v1779_v54 = vld [vmem:[%s3662_s13 + $0x8] sm:$0xff] }
 0x721   :  { %2693 = vmatprep.subr.bf16.mxu1 %v2692_v63 }
 0x724   :  { %2695 = vmatpush3.bf16.msra.mxu1 %v2692_v63 }
 0x725   :  { %2697 = vmatprep.subr.bf16.mxu1 %v2696_v25 }
 0x728   :  { %2699 = vmatpush3.bf16.msra.mxu1 %v2696_v25 }
 0x729   :  { %2701 = vmatprep.subr.bf16.mxu1 %v2700_v27 }
 0x72c   :  { %2703 = vmatpush3.bf16.msra.mxu1 %v2700_v27 }
 0x7e6   :  { %v2382_v28 = vpop.f32.mrb[24].mxu1 }
 0x7e7   :  { %v1424_v29 = vpop.f32.mrb[25].mxu1 }
 0x7e8   :  { %v1443_v30 = vadd.f32 %v2382_v28, %v1424_v29 }
 0x7ea   :  { %v2385_v31 = vpop.f32.mrb[26].mxu1 }
 0x7eb   :  { %v1434_v32 = vpop.f32.mrb[27].mxu1 }
 0x7ec   :  { %v1444_v33 = vadd.f32 %v1443_v30, %v1434_v32 }
 0x7ee   :  { %v1445_v34 = vadd.f32 %v2385_v31, %v1444_v33 }
 0x7f0   :  { %v1446_v35 = vrot.slane %v1445_v34, 4 }
 0x7f2   :  { %v1447_v42 = vadd.f32 %v1446_v35, %v1445_v34 }
 0x7f4   :  { %v1448_v43 = vrot.slane %v1447_v42, 2 }
 0x7f6   :  { %v1449_v49 = vadd.f32 %v1448_v43, %v1447_v42 }
 0x7f8   :  { %v1450_v56 = vrot.slane %v1449_v49, 1 }
 0x7fa   :  { %v1451_v58 = vadd.f32 %v1450_v56, %v1449_v49 }
 0x7fc   :  { %v1452_v61 = vmul.f32 0.03125, %v1451_v58 }
 0x7fe   :  { %v1453_v62 = vadd.f32 1e-05, %v1452_v61 }
 0x800   :  { %2790 = vrsqrt.f32 %v1453_v62 }
 0x80a   :  { %v2791_v1 = vpop.eup %2790 }
 0x80b   :  { %v1455_v4 = vmul.f32 %v2791_v1, %v3539_v52  ;;  %v1456_v5 = vmul.f32 %v2791_v1, %v3541_v53  ;;  %v1457_v6 = vmul.f32 %v2791_v1, %v3543_v55  ;;  %v1458_v7 = vmul.f32 %v2791_v1, %v3549_v59  ;;  %v1608_v52 = vld [vmem:[%s3660_s11 + $0x70] sm:$0xff]  ;;  %v1609_v53 = vld [vmem:[%s3660_s11 + $0x78] sm:$0xff] }
 0x80c   :  { %v2704_v55 = vpack.c.bf16 %v1609_v53, %v1608_v52 }
 0x80d   :  { %v1466_v9 = vmul.f32 %v1960_v2, %v1455_v4  ;;  %v1467_v36 = vmul.f32 %v1960_v2, %v1456_v5  ;;  %v1468_v10 = vmul.f32 %v1960_v2, %v1457_v6  ;;  %v1469_v38 = vmul.f32 %v1960_v2, %v1458_v7 }
 0x80e   :  { %2705 = vmatprep.subr.bf16.mxu1 %v2704_v55 }
 0x80f   :  { %v1477_v39 = vadd.f32 %v1961_v8, %v1466_v9  ;;  %v1478_v48 = vadd.f32 %v1961_v8, %v1467_v36  ;;  %v1479_v11 = vadd.f32 %v1961_v8, %v1468_v10  ;;  %v1480_v12 = vadd.f32 %v1961_v8, %v1469_v38  ;;  %2707 = vmatpush3.bf16.msra.mxu1 %v2704_v55 }
 0x811   :  { %v1481_v13 = vmax.f32 %v1477_v39, 0.0  ;;  %v1482_v14 = vmax.f32 %v1478_v48, 0.0  ;;  %v1483_v15 = vmax.f32 %v1479_v11, 0.0  ;;  %v1484_v16 = vmax.f32 %v1480_v12, 0.0 }
 0x813   :  { %2418 = vmatprep.mubr.f32.mxu0 %v1481_v13  ;;  %1485 = vst [vmem:[#allocation17] sm:$0xff] %v1481_v13  ;;  %1486 = vst [vmem:[#allocation17 + $0x8] sm:$0xff] %v1482_v14 }
 0x814   :  { %1487 = vst [vmem:[#allocation17 + $0x10] sm:$0xff] %v1483_v15  ;;  %1488 = vst [vmem:[#allocation17 + $0x18] sm:$0xff] %v1484_v16  ;;  %2419 = vmatmul.mubr.f32.vlgmr.msra.gmra.mrb[28].mxu0 %v1482_v14 }
 0x815   :  { %2421 = vmatprep.mubr.f32.mxu0 %v1483_v15 }
 0x818   :  { %2422 = vmatmul.mubr.f32.gmra.mrb[30].mxu0 %v1484_v16 }
 0x819   :  { %2470 = vmatprep.mubr.msk.f32.mxu0 %vm367_vm1, %v1695_v37 }
 0x8e7   :  { %v2420_v59 = vpop.f32.mrb[28].mxu0 }
 0x8e8   :  { %v1571_v17 = vpop.f32.mrb[29].mxu0  ;;  %v1591_v0 = vmax.f32 %v1482_v14, %v2420_v59 }
 0x8e9   :  { %v1590_v18 = vmax.f32 %v1481_v13, %v1571_v17 }
 0x8eb   :  { %v2423_v19 = vpop.f32.mrb[30].mxu0  ;;  %2456 = vmatprep.mubr.f32.mxu1 %v1590_v18 }
 0x8ec   :  { %v1581_v20 = vpop.f32.mrb[31].mxu0  ;;  %2457 = vmatmul.mubr.f32.vlgmr.msra.gmra.mrb[28].mxu1 %v1591_v0  ;;  %v1593_v22 = vmax.f32 %v1484_v16, %v2423_v19 }
 0x8ed   :  { %v1592_v21 = vmax.f32 %v1483_v15, %v1581_v20 }
 0x8ef   :  { %2459 = vmatprep.mubr.f32.mxu1 %v1592_v21 }
 0x8f0   :  { %2460 = vmatmul.mubr.f32.gmra.mrb[30].mxu1 %v1593_v22 }
 0x8f1   :  { %2481 = vmatprep.mubr.msk.f32.mxu1 %vm367_vm1, %v1778_v40 }
 0x9bf   :  { %v2458_v41 = vpop.f32.mrb[28].mxu1 }
 0x9c0   :  { %v1676_v44 = vpop.f32.mrb[29].mxu1 }
 0x9c1   :  { %v2708_v45 = vpack.c.bf16 %v2458_v41, %v1676_v44 }
 0x9c3   :  { %v2461_v46 = vpop.f32.mrb[30].mxu1  ;;  %2709 = vmatprep.subr.bf16.mxu0 %v2708_v45  ;;  %2717 = vmatprep.subr.bf16.mxu1 %v2708_v45 }
 0x9c4   :  { %v1686_v47 = vpop.f32.mrb[31].mxu1  ;;  %2711 = vmatpush3.bf16.msra.mxu0 %v2708_v45  ;;  %2719 = vmatpush3.bf16.msra.mxu1 %v2708_v45 }
 0x9c5   :  { %v2712_v50 = vpack.c.bf16 %v2461_v46, %v1686_v47 }
 0x9c7   :  { %2713 = vmatprep.subr.bf16.mxu0 %v2712_v50  ;;  %2721 = vmatprep.subr.bf16.mxu1 %v2712_v50 }
 0x9c8   :  { %2715 = vmatpush3.bf16.msra.mxu0 %v2712_v50  ;;  %2723 = vmatpush3.bf16.msra.mxu1 %v2712_v50 }
 0x9cb   :  { %2471 = vmatmul.mubr.msk.f32.vlgmr.msra.gmra.mrb[32].mxu0 %vm367_vm1, %v1696_v51  ;;  %2482 = vmatmul.mubr.msk.f32.vlgmr.msra.gmra.mrb[32].mxu1 %vm367_vm1, %v1779_v54 }
 0x9cc   :  { %3001 = shalt.err (!%p2998_p6)
}
 0x9cd   :  { %s3002_s0 = scalar_lea.hbm %s3663_s14, 512 }
 0x9ce   :  { %p3003_p7 = scmp.ne.s32.totalorder %s3663_s14, %s3002_s0  ;;  %p3006_p8 = scmp.lt.u32.totalorder %s3002_s0, %s3663_s14 }
 0x9d0   :  { %p3008_p9 = pnand %p3006_p8, %p3003_p7 }
 0x9d2   :  { %3011 = shalt.err (!%p3008_p9)
}
 0x9d3   :  { %1876 = dma.vmem_to_hbm [thread:$0]  %s1871_s8, 512, %s3663_s14, [#allocation4], %s3054_s18, %s3054_s18, %s3055_s27  }
 0x9d4   :  { %s3063_s9 = smov [#allocation18]  }
 0x9d5   :  { %s1882_s6 = sshll.u32 %s3063_s9, 4  ;;  %s1883_s6 = int_to_ptr.vmem [resolvable:$true] %s1882_s6 }
 0x9d6   :  { %s3012_s2 = scalar_lea.vmem %s1883_s6, 256  ;;  %p3017_p11 = scmp.lt.s32.totalorder %s1883_s6, %s1883_s6 }
 0x9d7   :  { %p3013_p10 = scmp.ne.s32.totalorder %s1883_s6, %s3012_s2  ;;  %p3018_p12 = scmp.lt.s32.totalorder %s3012_s2, %s3012_s2 }
 0x9d9   :  { %p3019_p13 = por %p3018_p12, %p3017_p11 }
 0x9db   :  { %p3020_p0 = pnand %p3019_p13, %p3013_p10 }
 0xa9e   :  { %v2472_v57 = vpop.f32.mrb[32].mxu0  ;;  %v2483_v60 = vpop.f32.mrb[32].mxu1 }
 0xa9f   :  { %v1862_v63 = vmax.f32 %v2472_v57, %v2483_v60  ;;  %v1769_v24 = vpop.f32.mrb[33].mxu0  ;;  %v1852_v23 = vpop.f32.mrb[33].mxu1 }
 0xaa0   :  { %v1861_v25 = vmax.f32 %v1769_v24, %v1852_v23 }
 0xaa1   :  { %1864 = vst.msk [vmem:[#allocation18 + $0x8] sm:$0xff] %vm254_vm0, %v1862_v63 }
 0xaa2   :  { %1863 = vst.msk [vmem:[#allocation18] sm:$0xff] %vm254_vm0, %v1861_v25 }
 0xaa3   :  { %3023 = shalt.err (!%p3020_p0)
}
 0xaa4   :  { %s3024_s3 = scalar_lea.hbm %s3664_s15, 256 }
 0xaa5   :  { %p3025_p1 = scmp.ne.s32.totalorder %s3664_s15, %s3024_s3  ;;  %p3028_p2 = scmp.lt.u32.totalorder %s3024_s3, %s3664_s15 }
 0xaa7   :  { %p3030_p3 = pnand %p3028_p2, %p3025_p1 }
 0xaa9   :  { %3033 = shalt.err (!%p3030_p3)
}
 0xaaa   :  { %1888 = dma.vmem_to_hbm [thread:$0]  %s1883_s6, 256, %s3664_s15, [#allocation19], %s3054_s18, %s3054_s18, %s3055_s27  }
 0xaab   :  { %3044 = dma.done.wait [#allocation4], 512  }
 0xaac   :  { %3045 = vsyncadd [#allocation4], 4294966784 }
 0xaad   :  { %3046 = dma.done.wait [#allocation19], 256  }
 0xaae   :  { %3047 = vsyncadd [#allocation19], 4294967040 }
 0xaaf   :  { %1895 = vsyncpa [#allocation3], 1 }
 0xab0   :  { %1896 = vsyncpa [#allocation6], 1 }
 0xab1   :  { %1897 = vsyncpa [#allocation9], 1 }
 0xab2   :  { %1898 = vsyncpa [#allocation12], 1 }
 0xab3   :  { %1899 = vsyncpa [#allocation15], 1 }
 0xab4   :  { %1900 = vsyncpa [#allocation4], 1 }
 0xab5   :  { %1901 = vsyncpa [#allocation19], 1 }

</bundles_post_ra>
